<compile_context>
chip_gen: v7x
topology: tpu7x:2x2x1
jax: 0.10.0
libtpu: 0.0.40
codegen_flags: <defaults>
</compile_context>

<pallas_src>
import functools

import jax
import jax.numpy as jnp
import numpy as np
from jax.experimental import pallas as pl
from jax.experimental.pallas import tpu as pltpu


# ----------------------------------------------------------------------------
# Fused digamma + lgamma for x > 0, shift-by-4:
#   psi(x)    = psi(z)    - sum_{k=0..3} 1/(x+k)        z = x + 4
#   lgamma(x) = lgamma(z) - sum_{k=0..3} log(x+k)
# The 4 reciprocals collapse to one divide and the 4 logs to one log via the
# grouped product p = x(x+1)(x+2)(x+3).  The asymptotic series at z >= 4 share
# 1/z (approx recip), 1/z^2 and log(z).
# EUP cost / element: 1 div + 2 log + 1 approx recip = 4 ops.
# ----------------------------------------------------------------------------
def _digamma_lgamma(x):
    x = x.astype(jnp.float32)
    t1, t2, t3 = x + 1.0, x + 2.0, x + 3.0
    p01 = x * t1
    p23 = t2 * t3
    p = p01 * p23                               # prod_{k=0..3}(x+k); OK for x < ~4e9

    # 1/x + 1/(x+1) + 1/(x+2) + 1/(x+3) = ((x + t1)*p23 + (t2 + t3)*p01) / p
    num = (x + t1) * p23 + (t2 + t3) * p01
    recip_sum = num / p                          # exact divide (feeds psi directly)
    log_sum = jnp.log(p)                         # sum_k log(x+k)

    z = x + 4.0
    inv = pl.reciprocal(z, approx=True)          # only feeds small correction terms
    inv2 = inv * inv
    log_z = jnp.log(z)

    # psi(z) ~ ln z - 1/(2z) - 1/(12 z^2) + 1/(120 z^4) - 1/(252 z^6)
    dig = log_z - 0.5 * inv - inv2 * (
        (1.0 / 12.0) - inv2 * ((1.0 / 120.0) - inv2 * (1.0 / 252.0)))

    # lgamma(z) ~ (z-1/2) ln z - z + ln(2 pi)/2 + 1/(12 z) - 1/(360 z^3) + 1/(1260 z^5)
    half_log_2pi = 0.9189385332046727
    lgam = (z - 0.5) * log_z - z + half_log_2pi + inv * (
        (1.0 / 12.0) - inv2 * ((1.0 / 360.0) - inv2 * (1.0 / 1260.0)))

    return dig - recip_sum, lgam - log_sum


# ----------------------------------------------------------------------------
# Kernel: one grid step handles a (C, 8, L) slab of alphas (C class planes, each
# a dense (8, L) sublane x lane tile of samples) and writes the (8, L) block of
# per-sample losses.  No state is carried across grid steps -> parallel grid.
# ----------------------------------------------------------------------------
def _uce_kernel(alphas_ref, targets_ref, out_ref, *, reg: float,
                n_total: int, w_total: int):
    i = pl.program_id(0)
    c, s8, lanes = alphas_ref.shape               # (C, 8, L)

    alphas = alphas_ref[...]                      # (C, 8, L) f32
    tgt = targets_ref[...]                        # (8, L) i32

    a0 = jnp.sum(alphas, axis=0)                  # (8, L)

    dg_a, lg_a = _digamma_lgamma(alphas)          # (C, 8, L)
    dg_a0, lg_a0 = _digamma_lgamma(a0)            # (8, L) - fully dense path

    class_ids = jax.lax.broadcasted_iota(jnp.int32, (c, s8, lanes), 0)
    one_hot = (class_ids == tgt).astype(jnp.float32)   # broadcast (8,L)->(C,8,L)

    regf = jnp.float32(reg)
    # Per-class fused term:
    #   T = (reg*(alpha - 1) - one_hot) * digamma(alpha) - reg * lgamma(alpha)
    t = (regf * (alphas - 1.0) - one_hot) * dg_a - regf * lg_a

    per_sample = (jnp.sum(t, axis=0)
                  + dg_a0
                  + regf * lg_a0
                  + regf * (jnp.float32(c) - a0) * dg_a0)     # (8, L)

    # Mask padded samples (global sample index n = s*W + i*L + l).
    s_iota = jax.lax.broadcasted_iota(jnp.int32, (s8, lanes), 0)
    l_iota = jax.lax.broadcasted_iota(jnp.int32, (s8, lanes), 1)
    n_idx = s_iota * w_total + i * lanes + l_iota
    out_ref[...] = jnp.where(n_idx < n_total, per_sample, 0.0)


def _round_up(x: int, m: int) -> int:
    return ((x + m - 1) // m) * m


def _cdiv(a: int, b: int) -> int:
    return (a + b - 1) // b


_TILE_QUANTUM = 1024    # 8 sublanes x 128 lanes of samples


def regularized_uce_loss(alphas: jax.Array, targets: jax.Array,
                         regularization_factor: float) -> jax.Array:
    """alphas: (N, C) positive; targets: (N,) int in [0, C)."""
    n, c = alphas.shape

    # ---- tile sizing: few big steps, balanced against tail padding, VMEM-safe ---
    vmem_budget = 12 * 1024 * 1024      # under scoped default on v5e/v6e/v7x
    live_slabs = 16                     # double-buffered inputs + live f32 temporaries
    bytes_per_col = 4 * c * live_slabs + 64
    max_tile = (vmem_budget // bytes_per_col) // _TILE_QUANTUM * _TILE_QUANTUM
    max_tile = max(_TILE_QUANTUM, min(32768, max_tile))
    num_tiles = _cdiv(n, max_tile)
    tile_n = min(max_tile, _round_up(_cdiv(n, num_tiles), _TILE_QUANTUM))
    grid_n = _cdiv(n, tile_n)
    n_pad = grid_n * tile_n
    w = n_pad // 8                      # lane width of the (8, W) sample layout
    l = tile_n // 8                     # lanes per grid step (multiple of 128)

    # ---- layout: (C, 8, W) alphas, (8, W) targets; one fused transpose+pad copy --
    alphas_t = jnp.pad(alphas.astype(jnp.float32).T,
                       ((0, 0), (0, n_pad - n)), constant_values=1.0)
    alphas_t = alphas_t.reshape(c, 8, w)
    targets_p = jnp.pad(targets.astype(jnp.int32), (0, n_pad - n)).reshape(8, w)

    cost = pl.CostEstimate(
        flops=int(45 * n * (c + 1)),
        transcendentals=int(4 * n * (c + 1)),
        bytes_accessed=int(4 * n * (c + 2)),
    )

    kernel = functools.partial(_uce_kernel,
                               reg=float(regularization_factor),
                               n_total=n, w_total=w)

    per_sample = pl.pallas_call(
        kernel,
        out_shape=jax.ShapeDtypeStruct((8, w), jnp.float32),
        grid=(grid_n,),
        in_specs=[
            pl.BlockSpec((c, 8, l), lambda i: (0, 0, i)),
            pl.BlockSpec((8, l), lambda i: (0, i)),
        ],
        out_specs=pl.BlockSpec((8, l), lambda i: (0, i)),
        compiler_params=pltpu.CompilerParams(
            dimension_semantics=("parallel",)),
        cost_estimate=cost,
    )(alphas_t, targets_p)

    # Padded samples were written as 0; final mean in plain XLA (also keeps the
    # accumulation precise for large N).
    return jnp.sum(per_sample) / jnp.float32(n)


# ----------------------------------------------------------------------------
# Pure-JAX reference (mirrors the PyTorch module) for a sanity check
# ----------------------------------------------------------------------------
def _reference(alphas, targets, reg):
    from jax.scipy.special import digamma, gammaln

    n, c = alphas.shape
    one_hot = jax.nn.one_hot(targets, c, dtype=jnp.float32)
    a0 = jnp.sum(alphas, axis=1)
    uce = jnp.sum(one_hot * (digamma(a0)[:, None] - digamma(alphas)), axis=1)
    entropy = (
        jnp.sum(gammaln(alphas), axis=1)
        - gammaln(a0)
        - (c - a0) * digamma(a0)
        - jnp.sum((alphas - 1.0) * digamma(alphas), axis=1)
    )
    return jnp.mean(uce) - reg * jnp.mean(entropy)


if __name__ == "__main__":
    REG = 1e-3

    # --- small shape consistent with the module: batch=8, classes=16 ---------
    k_alpha, k_tgt = jax.random.split(jax.random.PRNGKey(0))
    N, C = 8, 16
    alphas = jnp.exp(jax.random.normal(k_alpha, (N, C), dtype=jnp.float32)) + 0.1
    targets = jax.random.randint(k_tgt, (N,), 0, C, dtype=jnp.int32)

    loss = jax.block_until_ready(regularized_uce_loss(alphas, targets, REG))
    ref = jax.block_until_ready(_reference(alphas, targets, REG))
    np.testing.assert_allclose(np.asarray(loss), np.asarray(ref),
                               rtol=2e-3, atol=2e-3)

    # --- a ragged batch with C not a multiple of 8 (exercises masking) -------
    k_a2, k_t2 = jax.random.split(jax.random.PRNGKey(1))
    N2, C2 = 300, 10
    alphas2 = jnp.exp(jax.random.normal(k_a2, (N2, C2), dtype=jnp.float32)) + 0.1
    targets2 = jax.random.randint(k_t2, (N2,), 0, C2, dtype=jnp.int32)

    loss2 = jax.block_until_ready(regularized_uce_loss(alphas2, targets2, REG))
    ref2 = jax.block_until_ready(_reference(alphas2, targets2, REG))
    np.testing.assert_allclose(np.asarray(loss2), np.asarray(ref2),
                               rtol=2e-3, atol=2e-3)

    print("KERNEL_OK")
</pallas_src>

<mosaic_0001>
module attributes {stable_mosaic.version = 11 : i64} {
  func.func @_uce_kernel(%arg0: i32, %arg1: memref<16x8x128xf32, #tpu.memory_space<vmem>>, %arg2: memref<8x128xi32, #tpu.memory_space<vmem>>, %arg3: memref<8x128xf32, #tpu.memory_space<vmem>>) attributes {dimension_semantics = [#tpu.dimension_semantics<parallel>], iteration_bounds = array<i64: 1>, scalar_prefetch = 0 : i64, scratch_operands = 0 : i64, tpu.core_type = #tpu.core_type<tc>, window_params = [{transform_indices = @transform_0, window_bounds = array<i64: 16, 8, 128>}, {transform_indices = @transform_1, window_bounds = array<i64: 8, 128>}, {transform_indices = @transform_2, window_bounds = array<i64: 8, 128>}]} {
    %c0 = arith.constant 0 : index
    %c0_0 = arith.constant 0 : index
    %c0_1 = arith.constant 0 : index
    %0 = vector.load %arg1[%c0, %c0_0, %c0_1] : memref<16x8x128xf32, #tpu.memory_space<vmem>>, vector<16x8x128xf32>
    %c0_2 = arith.constant 0 : index
    %c0_3 = arith.constant 0 : index
    %1 = vector.load %arg2[%c0_2, %c0_3] : memref<8x128xi32, #tpu.memory_space<vmem>>, vector<8x128xi32>
    %cst = arith.constant dense<0.000000e+00> : vector<8x128xf32>
    %2 = vector.multi_reduction <add>, %0, %cst [0] : vector<16x8x128xf32> to vector<8x128xf32>
    %cst_4 = arith.constant 1.000000e+00 : f32
    %3 = vector.broadcast %cst_4 : f32 to vector<16x8x128xf32>
    %4 = arith.addf %0, %3 : vector<16x8x128xf32>
    %cst_5 = arith.constant 2.000000e+00 : f32
    %5 = vector.broadcast %cst_5 : f32 to vector<16x8x128xf32>
    %6 = arith.addf %0, %5 : vector<16x8x128xf32>
    %cst_6 = arith.constant 3.000000e+00 : f32
    %7 = vector.broadcast %cst_6 : f32 to vector<16x8x128xf32>
    %8 = arith.addf %0, %7 : vector<16x8x128xf32>
    %9 = arith.mulf %0, %4 : vector<16x8x128xf32>
    %10 = arith.mulf %6, %8 : vector<16x8x128xf32>
    %11 = arith.mulf %9, %10 : vector<16x8x128xf32>
    %12 = arith.addf %0, %4 : vector<16x8x128xf32>
    %13 = arith.mulf %12, %10 : vector<16x8x128xf32>
    %14 = arith.addf %6, %8 : vector<16x8x128xf32>
    %15 = arith.mulf %14, %9 : vector<16x8x128xf32>
    %16 = arith.addf %13, %15 : vector<16x8x128xf32>
    %17 = arith.divf %16, %11 : vector<16x8x128xf32>
    %18 = math.log %11 : vector<16x8x128xf32>
    %cst_7 = arith.constant 4.000000e+00 : f32
    %19 = vector.broadcast %cst_7 : f32 to vector<16x8x128xf32>
    %20 = arith.addf %0, %19 : vector<16x8x128xf32>
    %21 = tpu.reciprocal %20 {approx = true} : vector<16x8x128xf32> -> vector<16x8x128xf32>
    %22 = arith.mulf %21, %21 : vector<16x8x128xf32>
    %23 = math.log %20 : vector<16x8x128xf32>
    %cst_8 = arith.constant 5.000000e-01 : f32
    %24 = vector.broadcast %cst_8 : f32 to vector<16x8x128xf32>
    %25 = arith.mulf %24, %21 : vector<16x8x128xf32>
    %26 = arith.subf %23, %25 : vector<16x8x128xf32>
    %cst_9 = arith.constant 0.0039682542 : f32
    %27 = vector.broadcast %cst_9 : f32 to vector<16x8x128xf32>
    %28 = arith.mulf %22, %27 : vector<16x8x128xf32>
    %cst_10 = arith.constant 0.00833333377 : f32
    %29 = vector.broadcast %cst_10 : f32 to vector<16x8x128xf32>
    %30 = arith.subf %29, %28 : vector<16x8x128xf32>
    %31 = arith.mulf %22, %30 : vector<16x8x128xf32>
    %cst_11 = arith.constant 0.0833333358 : f32
    %32 = vector.broadcast %cst_11 : f32 to vector<16x8x128xf32>
    %33 = arith.subf %32, %31 : vector<16x8x128xf32>
    %34 = arith.mulf %22, %33 : vector<16x8x128xf32>
    %35 = arith.subf %26, %34 : vector<16x8x128xf32>
    %cst_12 = arith.constant 5.000000e-01 : f32
    %36 = vector.broadcast %cst_12 : f32 to vector<16x8x128xf32>
    %37 = arith.subf %20, %36 : vector<16x8x128xf32>
    %38 = arith.mulf %37, %23 : vector<16x8x128xf32>
    %39 = arith.subf %38, %20 : vector<16x8x128xf32>
    %cst_13 = arith.constant 0.918938517 : f32
    %40 = vector.broadcast %cst_13 : f32 to vector<16x8x128xf32>
    %41 = arith.addf %39, %40 : vector<16x8x128xf32>
    %cst_14 = arith.constant 7.93650805E-4 : f32
    %42 = vector.broadcast %cst_14 : f32 to vector<16x8x128xf32>
    %43 = arith.mulf %22, %42 : vector<16x8x128xf32>
    %cst_15 = arith.constant 0.00277777785 : f32
    %44 = vector.broadcast %cst_15 : f32 to vector<16x8x128xf32>
    %45 = arith.subf %44, %43 : vector<16x8x128xf32>
    %46 = arith.mulf %22, %45 : vector<16x8x128xf32>
    %cst_16 = arith.constant 0.0833333358 : f32
    %47 = vector.broadcast %cst_16 : f32 to vector<16x8x128xf32>
    %48 = arith.subf %47, %46 : vector<16x8x128xf32>
    %49 = arith.mulf %21, %48 : vector<16x8x128xf32>
    %50 = arith.addf %41, %49 : vector<16x8x128xf32>
    %51 = arith.subf %35, %17 : vector<16x8x128xf32>
    %52 = arith.subf %50, %18 : vector<16x8x128xf32>
    %cst_17 = arith.constant 1.000000e+00 : f32
    %53 = vector.broadcast %cst_17 : f32 to vector<8x128xf32>
    %54 = arith.addf %2, %53 : vector<8x128xf32>
    %cst_18 = arith.constant 2.000000e+00 : f32
    %55 = vector.broadcast %cst_18 : f32 to vector<8x128xf32>
    %56 = arith.addf %2, %55 : vector<8x128xf32>
    %cst_19 = arith.constant 3.000000e+00 : f32
    %57 = vector.broadcast %cst_19 : f32 to vector<8x128xf32>
    %58 = arith.addf %2, %57 : vector<8x128xf32>
    %59 = arith.mulf %2, %54 : vector<8x128xf32>
    %60 = arith.mulf %56, %58 : vector<8x128xf32>
    %61 = arith.mulf %59, %60 : vector<8x128xf32>
    %62 = arith.addf %2, %54 : vector<8x128xf32>
    %63 = arith.mulf %62, %60 : vector<8x128xf32>
    %64 = arith.addf %56, %58 : vector<8x128xf32>
    %65 = arith.mulf %64, %59 : vector<8x128xf32>
    %66 = arith.addf %63, %65 : vector<8x128xf32>
    %67 = arith.divf %66, %61 : vector<8x128xf32>
    %68 = math.log %61 : vector<8x128xf32>
    %cst_20 = arith.constant 4.000000e+00 : f32
    %69 = vector.broadcast %cst_20 : f32 to vector<8x128xf32>
    %70 = arith.addf %2, %69 : vector<8x128xf32>
    %71 = tpu.reciprocal %70 {approx = true} : vector<8x128xf32> -> vector<8x128xf32>
    %72 = arith.mulf %71, %71 : vector<8x128xf32>
    %73 = math.log %70 : vector<8x128xf32>
    %cst_21 = arith.constant 5.000000e-01 : f32
    %74 = vector.broadcast %cst_21 : f32 to vector<8x128xf32>
    %75 = arith.mulf %74, %71 : vector<8x128xf32>
    %76 = arith.subf %73, %75 : vector<8x128xf32>
    %cst_22 = arith.constant 0.0039682542 : f32
    %77 = vector.broadcast %cst_22 : f32 to vector<8x128xf32>
    %78 = arith.mulf %72, %77 : vector<8x128xf32>
    %cst_23 = arith.constant 0.00833333377 : f32
    %79 = vector.broadcast %cst_23 : f32 to vector<8x128xf32>
    %80 = arith.subf %79, %78 : vector<8x128xf32>
    %81 = arith.mulf %72, %80 : vector<8x128xf32>
    %cst_24 = arith.constant 0.0833333358 : f32
    %82 = vector.broadcast %cst_24 : f32 to vector<8x128xf32>
    %83 = arith.subf %82, %81 : vector<8x128xf32>
    %84 = arith.mulf %72, %83 : vector<8x128xf32>
    %85 = arith.subf %76, %84 : vector<8x128xf32>
    %cst_25 = arith.constant 5.000000e-01 : f32
    %86 = vector.broadcast %cst_25 : f32 to vector<8x128xf32>
    %87 = arith.subf %70, %86 : vector<8x128xf32>
    %88 = arith.mulf %87, %73 : vector<8x128xf32>
    %89 = arith.subf %88, %70 : vector<8x128xf32>
    %cst_26 = arith.constant 0.918938517 : f32
    %90 = vector.broadcast %cst_26 : f32 to vector<8x128xf32>
    %91 = arith.addf %89, %90 : vector<8x128xf32>
    %cst_27 = arith.constant 7.93650805E-4 : f32
    %92 = vector.broadcast %cst_27 : f32 to vector<8x128xf32>
    %93 = arith.mulf %72, %92 : vector<8x128xf32>
    %cst_28 = arith.constant 0.00277777785 : f32
    %94 = vector.broadcast %cst_28 : f32 to vector<8x128xf32>
    %95 = arith.subf %94, %93 : vector<8x128xf32>
    %96 = arith.mulf %72, %95 : vector<8x128xf32>
    %cst_29 = arith.constant 0.0833333358 : f32
    %97 = vector.broadcast %cst_29 : f32 to vector<8x128xf32>
    %98 = arith.subf %97, %96 : vector<8x128xf32>
    %99 = arith.mulf %71, %98 : vector<8x128xf32>
    %100 = arith.addf %91, %99 : vector<8x128xf32>
    %101 = arith.subf %85, %67 : vector<8x128xf32>
    %102 = arith.subf %100, %68 : vector<8x128xf32>
    %103 = tpu.iota {dimensions = array<i32: 0>} : vector<16x8x128xi32>
    %104 = vector.shape_cast %1 : vector<8x128xi32> to vector<1x8x128xi32>
    %105 = vector.broadcast %104 : vector<1x8x128xi32> to vector<16x8x128xi32>
    %106 = arith.cmpi eq, %103, %105 : vector<16x8x128xi32>
    %107 = arith.extui %106 : vector<16x8x128xi1> to vector<16x8x128xi32>
    %108 = arith.sitofp %107 : vector<16x8x128xi32> to vector<16x8x128xf32>
    %cst_30 = arith.constant 1.000000e+00 : f32
    %109 = vector.broadcast %cst_30 : f32 to vector<16x8x128xf32>
    %110 = arith.subf %0, %109 : vector<16x8x128xf32>
    %cst_31 = arith.constant 1.000000e-03 : f32
    %111 = vector.broadcast %cst_31 : f32 to vector<16x8x128xf32>
    %112 = arith.mulf %111, %110 : vector<16x8x128xf32>
    %113 = arith.subf %112, %108 : vector<16x8x128xf32>
    %114 = arith.mulf %113, %51 : vector<16x8x128xf32>
    %cst_32 = arith.constant 1.000000e-03 : f32
    %115 = vector.broadcast %cst_32 : f32 to vector<16x8x128xf32>
    %116 = arith.mulf %115, %52 : vector<16x8x128xf32>
    %117 = arith.subf %114, %116 : vector<16x8x128xf32>
    %cst_33 = arith.constant dense<0.000000e+00> : vector<8x128xf32>
    %118 = vector.multi_reduction <add>, %117, %cst_33 [0] : vector<16x8x128xf32> to vector<8x128xf32>
    %119 = arith.addf %118, %101 : vector<8x128xf32>
    %cst_34 = arith.constant 1.000000e-03 : f32
    %120 = vector.broadcast %cst_34 : f32 to vector<8x128xf32>
    %121 = arith.mulf %120, %102 : vector<8x128xf32>
    %122 = arith.addf %119, %121 : vector<8x128xf32>
    %cst_35 = arith.constant 1.600000e+01 : f32
    %123 = vector.broadcast %cst_35 : f32 to vector<8x128xf32>
    %124 = arith.subf %123, %2 : vector<8x128xf32>
    %cst_36 = arith.constant 1.000000e-03 : f32
    %125 = vector.broadcast %cst_36 : f32 to vector<8x128xf32>
    %126 = arith.mulf %125, %124 : vector<8x128xf32>
    %127 = arith.mulf %126, %101 : vector<8x128xf32>
    %128 = arith.addf %122, %127 : vector<8x128xf32>
    %129 = tpu.iota {dimensions = array<i32: 0>} : vector<8x128xi32>
    %130 = tpu.iota {dimensions = array<i32: 1>} : vector<8x128xi32>
    %c128_i32 = arith.constant 128 : i32
    %131 = vector.broadcast %c128_i32 : i32 to vector<8x128xi32>
    %132 = arith.muli %129, %131 : vector<8x128xi32>
    %c128_i32_37 = arith.constant 128 : i32
    %133 = arith.muli %arg0, %c128_i32_37 : i32
    %134 = vector.broadcast %133 : i32 to vector<8x128xi32>
    %135 = arith.addi %132, %134 : vector<8x128xi32>
    %136 = arith.addi %135, %130 : vector<8x128xi32>
    %c8_i32 = arith.constant 8 : i32
    %137 = vector.broadcast %c8_i32 : i32 to vector<8x128xi32>
    %138 = arith.cmpi slt, %136, %137 : vector<8x128xi32>
    %cst_38 = arith.constant 0.000000e+00 : f32
    %139 = vector.broadcast %cst_38 : f32 to vector<8x128xf32>
    %140 = arith.select %138, %128, %139 : vector<8x128xi1>, vector<8x128xf32>
    %c0_39 = arith.constant 0 : index
    %c0_40 = arith.constant 0 : index
    %141 = vector.load %arg3[%c0_39, %c0_40] : memref<8x128xf32, #tpu.memory_space<vmem>>, vector<8x128xf32>
    tpu.vector_store %arg3[%c0_39, %c0_40], %140 {strides = array<i32>} : memref<8x128xf32, #tpu.memory_space<vmem>>, vector<8x128xf32>,
    return
  }
  func.func @transform_0(%arg0: i32) -> (i32, i32, i32) {
    %c0_i32 = arith.constant 0 : i32
    %c0_i32_0 = arith.constant 0 : i32
    %c0_i32_1 = arith.constant 0 : i32
    return %c0_i32, %c0_i32_0, %arg0 : i32, i32, i32
  }
  func.func @transform_1(%arg0: i32) -> (i32, i32) {
    %c0_i32 = arith.constant 0 : i32
    %c0_i32_0 = arith.constant 0 : i32
    return %c0_i32, %arg0 : i32, i32
  }
  func.func @transform_2(%arg0: i32) -> (i32, i32) {
    %c0_i32 = arith.constant 0 : i32
    %c0_i32_0 = arith.constant 0 : i32
    return %c0_i32, %arg0 : i32, i32
  }
}

</mosaic_0001>

<bundles_post_ra>
// kernel: tpu_custom_call.1
= control target key start
LH: loop header
LB: loop body
LE: loop exit
PB: predicated region body
PF: predicated region fallthrough
CT: control target
= control target key end

     0   :  { %7 = vsyncpa [#allocation3], 0  ;;  %s2807_s0 = inlined_call_operand.hbm [shape: f32[16,8,128], index: 0, kind: input, shape index: {}]   ;;  %s2808_s1 = inlined_call_operand.hbm [shape: s32[8,128], index: 1, kind: input, shape index: {}]   ;;  %s2809_s2 = inlined_call_operand.hbm [shape: f32[8,128], index: 2, kind: output, shape index: {}]  }
   0x1   :  { %8 = vsyncpa [#allocation6], 0 }
   0x2   :  { %9 = vsyncpa [#allocation4], 0  ;;  %s1207_s9 = smov [#allocation2]   ;;  %s1135_s13 = scalar_lea.hbm %s2807_s0, 2048 }
   0x3   :  { %s15_s10 = sshll.u32 %s1207_s9, 4  ;;  %p1136_p0 = scmp.ne.s32.totalorder %s2807_s0, %s1135_s13  ;;  %s16_s10 = int_to_ptr.vmem [resolvable:$true] %s15_s10 }
   0x4   :  { %p1139_p1 = scmp.lt.u32.totalorder %s1135_s13, %s2807_s0 }
   0x6   :  { %p1141_p2 = pnand %p1139_p1, %p1136_p0 }
   0x8   :  { %1144 = shalt.err (!%p1141_p2)
}
   0x9   :  { %s1145_s18 = scalar_lea.vmem %s16_s10, 2048  ;;  %p1150_p4 = scmp.lt.s32.totalorder %s16_s10, %s16_s10 }
   0xa   :  { %p1146_p3 = scmp.ne.s32.totalorder %s16_s10, %s1145_s18  ;;  %p1151_p5 = scmp.lt.s32.totalorder %s1145_s18, %s1145_s18 }
   0xc   :  { %p1152_p6 = por %p1151_p5, %p1150_p4 }
   0xe   :  { %p1153_p7 = pnand %p1152_p6, %p1146_p3 }
  0x10   :  { %1156 = shalt.err (!%p1153_p7)
}
  0x11   :  { %s1208_s19 = smov 128   ;;  %s1209_s20 = smov 8  }
  0x12   :  { %21 = dma.hbm_to_vmem [thread:$0]  %s2807_s0, 2048, %s16_s10, [#allocation3], %s1208_s19, %s1208_s19, %s1209_s20  }
  0x13   :  { %s1210_s23 = smov [#allocation5]   ;;  %s1157_s27 = scalar_lea.hbm %s2808_s1, 128 }
  0x14   :  { %s28_s24 = sshll.u32 %s1210_s23, 4  ;;  %p1158_p8 = scmp.ne.s32.totalorder %s2808_s1, %s1157_s27  ;;  %s29_s24 = int_to_ptr.vmem [resolvable:$true] %s28_s24 }
  0x15   :  { %p1161_p9 = scmp.lt.u32.totalorder %s1157_s27, %s2808_s1 }
  0x17   :  { %p1163_p10 = pnand %p1161_p9, %p1158_p8 }
  0x19   :  { %1166 = shalt.err (!%p1163_p10)
}
  0x1a   :  { %s1167_s4 = scalar_lea.vmem %s29_s24, 128  ;;  %p1172_p12 = scmp.lt.s32.totalorder %s29_s24, %s29_s24 }
  0x1b   :  { %p1168_p11 = scmp.ne.s32.totalorder %s29_s24, %s1167_s4  ;;  %p1173_p13 = scmp.lt.s32.totalorder %s1167_s4, %s1167_s4 }
  0x1d   :  { %p1174_p0 = por %p1173_p13, %p1172_p12 }
  0x1f   :  { %p1175_p1 = pnand %p1174_p0, %p1168_p11 }
  0x21   :  { %1178 = shalt.err (!%p1175_p1)
}
  0x22   :  { %31 = dma.hbm_to_vmem [thread:$0]  %s2808_s1, 128, %s29_s24, [#allocation6]  }
  0x23   :  { %1201 = dma.done.wait [#allocation3], 2048  }
  0x24   :  { %1202 = vsyncadd [#allocation3], 4294965248 }
  0x25   :  { %1203 = dma.done.wait [#allocation6], 128  }
  0x26   :  { %1204 = vsyncadd [#allocation6], 4294967168  ;;  %v1252_v0 = vld [vmem:[#allocation2] sm:$0xff]  ;;  %v1254_v1 = vld [vmem:[#allocation2 + $0x8] sm:$0xff]  ;;  %s1212_s1 = smov [#allocation7]  }
  0x27   :  { %3014 = vst [vmem:[#allocation11_spill] sm:$0xff] %v1252_v0  ;;  %3015 = vst [vmem:[#allocation12_spill] sm:$0xff] %v1254_v1  ;;  %v55_v2 = vadd.f32 %v1254_v1, %v1252_v0  ;;  %v1258_v3 = vld [vmem:[#allocation2 + $0x10] sm:$0xff]  ;;  %v1261_v5 = vld [vmem:[#allocation2 + $0x18] sm:$0xff]  ;;  %v1280_v17 = vadd.f32 1.0, %v1252_v0  ;;  %v1285_v19 = vadd.f32 1.0, %v1254_v1 }
  0x28   :  { %3016 = vst [vmem:[#allocation13_spill] sm:$0xff] %v1258_v3  ;;  %3017 = vst [vmem:[#allocation14_spill] sm:$0xff] %v1261_v5  ;;  %v1264_v7 = vld [vmem:[#allocation2 + $0x20] sm:$0xff]  ;;  %v1267_v9 = vld [vmem:[#allocation2 + $0x28] sm:$0xff]  ;;  %v1288_v20 = vadd.f32 1.0, %v1258_v3  ;;  %v1291_v21 = vadd.f32 1.0, %v1261_v5 }
  0x29   :  { %v56_v4 = vadd.f32 %v55_v2, %v1258_v3  ;;  %3018 = vst [vmem:[#allocation15_spill] sm:$0xff] %v1264_v7  ;;  %3019 = vst [vmem:[#allocation16_spill] sm:$0xff] %v1267_v9  ;;  %v1270_v11 = vld [vmem:[#allocation2 + $0x30] sm:$0xff]  ;;  %v1273_v13 = vld [vmem:[#allocation2 + $0x38] sm:$0xff]  ;;  %v1299_v25 = vadd.f32 1.0, %v1264_v7  ;;  %v1302_v26 = vadd.f32 1.0, %v1267_v9  ;;  %v1338_v39 = vmul.f32 %v1280_v17, %v1252_v0 }
  0x2a   :  { %3020 = vst [vmem:[#allocation17_spill] sm:$0xff] %v1270_v11  ;;  %3021 = vst [vmem:[#allocation18_spill] sm:$0xff] %v1273_v13  ;;  %v1276_v15 = vld [vmem:[#allocation2 + $0x40] sm:$0xff]  ;;  %v1282_v18 = vld [vmem:[#allocation2 + $0x48] sm:$0xff]  ;;  %v1305_v27 = vadd.f32 1.0, %v1270_v11  ;;  %v1312_v30 = vadd.f32 1.0, %v1273_v13 }
  0x2b   :  { %v57_v6 = vadd.f32 %v56_v4, %v1261_v5  ;;  %3022 = vst [vmem:[#allocation19_spill] sm:$0xff] %v1276_v15  ;;  %3023 = vst [vmem:[#allocation20_spill] sm:$0xff] %v1280_v17  ;;  %v1293_v22 = vld [vmem:[#allocation2 + $0x50] sm:$0xff]  ;;  %v1295_v23 = vld [vmem:[#allocation2 + $0x58] sm:$0xff]  ;;  %v1315_v31 = vadd.f32 1.0, %v1276_v15  ;;  %v1318_v32 = vadd.f32 1.0, %v1282_v18 }
  0x2c   :  { %3024 = vst [vmem:[#allocation21_spill] sm:$0xff] %v1282_v18  ;;  %3025 = vst [vmem:[#allocation22_spill] sm:$0xff] %v1288_v20  ;;  %v1307_v28 = vld [vmem:[#allocation2 + $0x60] sm:$0xff]  ;;  %v1309_v29 = vld [vmem:[#allocation2 + $0x68] sm:$0xff]  ;;  %v1321_v33 = vadd.f32 1.0, %v1293_v22  ;;  %v1328_v36 = vadd.f32 1.0, %v1295_v23 }
  0x2d   :  { %v58_v8 = vadd.f32 %v57_v6, %v1264_v7  ;;  %3026 = vst [vmem:[#allocation23_spill] sm:$0xff] %v1291_v21  ;;  %3027 = vst [vmem:[#allocation24_spill] sm:$0xff] %v1293_v22  ;;  %v1323_v34 = vld [vmem:[#allocation2 + $0x70] sm:$0xff]  ;;  %v1325_v35 = vld [vmem:[#allocation2 + $0x78] sm:$0xff]  ;;  %v1331_v37 = vadd.f32 1.0, %v1307_v28  ;;  %v1334_v38 = vadd.f32 1.0, %v1309_v29 }
  0x2e   :  { %3028 = vst [vmem:[#allocation25_spill] sm:$0xff] %v1295_v23  ;;  %3029 = vst [vmem:[#allocation26_spill] sm:$0xff] %v1299_v25  ;;  %v1341_v40 = vadd.f32 1.0, %v1323_v34  ;;  %v1344_v41 = vadd.f32 1.0, %v1325_v35  ;;  %v1347_v42 = vadd.f32 2.0, %v1252_v0  ;;  %v1350_v43 = vadd.f32 2.0, %v1254_v1 }
  0x2f   :  { %v59_v10 = vadd.f32 %v58_v8, %v1267_v9  ;;  %3030 = vst [vmem:[#allocation27_spill] sm:$0xff] %v1302_v26  ;;  %3031 = vst [vmem:[#allocation28_spill] sm:$0xff] %v1305_v27  ;;  %v1354_v45 = vadd.f32 2.0, %v1258_v3  ;;  %v1357_v46 = vadd.f32 2.0, %v1261_v5  ;;  %v1360_v47 = vadd.f32 2.0, %v1264_v7  ;;  %s934_s6 = sshll.u32 %s1212_s1, 4  ;;  %s935_s6 = int_to_ptr.vmem [resolvable:$true] %s934_s6 }
  0x30   :  { %3032 = vst [vmem:[#allocation29_spill] sm:$0xff] %v1307_v28  ;;  %3033 = vst [vmem:[#allocation30_spill] sm:$0xff] %v1309_v29  ;;  %v1363_v48 = vadd.f32 2.0, %v1267_v9  ;;  %v1366_v49 = vadd.f32 2.0, %v1270_v11  ;;  %v1369_v50 = vadd.f32 2.0, %v1273_v13  ;;  %v1372_v51 = vadd.f32 2.0, %v1276_v15  ;;  %p1184_p3 = scmp.lt.s32.totalorder %s935_s6, %s935_s6 }
  0x31   :  { %v60_v12 = vadd.f32 %v59_v10, %v1270_v11  ;;  %3034 = vst [vmem:[#allocation31_spill] sm:$0xff] %v1312_v30  ;;  %3035 = vst [vmem:[#allocation32_spill] sm:$0xff] %v1315_v31  ;;  %v1375_v52 = vadd.f32 2.0, %v1282_v18  ;;  %v1378_v53 = vadd.f32 2.0, %v1293_v22  ;;  %v1381_v54 = vadd.f32 2.0, %v1295_v23  ;;  %s1179_s7 = scalar_lea.vmem %s935_s6, 128 }
  0x32   :  { %3036 = vst [vmem:[#allocation33_spill] sm:$0xff] %v1318_v32  ;;  %3037 = vst [vmem:[#allocation34_spill] sm:$0xff] %v1321_v33  ;;  %v1384_v55 = vadd.f32 2.0, %v1307_v28  ;;  %v1387_v56 = vadd.f32 2.0, %v1309_v29  ;;  %v1390_v57 = vadd.f32 2.0, %v1323_v34  ;;  %v1393_v58 = vadd.f32 2.0, %v1325_v35  ;;  %p1180_p2 = scmp.ne.s32.totalorder %s935_s6, %s1179_s7  ;;  %p1185_p4 = scmp.lt.s32.totalorder %s1179_s7, %s1179_s7 }
  0x33   :  { %v61_v14 = vadd.f32 %v60_v12, %v1273_v13  ;;  %3038 = vst [vmem:[#allocation35_spill] sm:$0xff] %v1323_v34  ;;  %3039 = vst [vmem:[#allocation36_spill] sm:$0xff] %v1325_v35  ;;  %v1396_v59 = vadd.f32 3.0, %v1252_v0  ;;  %v1400_v61 = vadd.f32 3.0, %v1254_v1  ;;  %v1403_v62 = vadd.f32 3.0, %v1258_v3 }
  0x34   :  { %3040 = vst [vmem:[#allocation37_spill] sm:$0xff] %v1328_v36  ;;  %3041 = vst [vmem:[#allocation38_spill] sm:$0xff] %v1331_v37  ;;  %v1406_v63 = vadd.f32 3.0, %v1261_v5  ;;  %v1409_v2 = vadd.f32 3.0, %v1264_v7  ;;  %v1412_v4 = vadd.f32 3.0, %v1267_v9  ;;  %v1415_v6 = vadd.f32 3.0, %v1270_v11  ;;  %p1186_p5 = por %p1185_p4, %p1184_p3 }
  0x35   :  { %v62_v16 = vadd.f32 %v61_v14, %v1276_v15  ;;  %3042 = vst [vmem:[#allocation39_spill] sm:$0xff] %v1334_v38  ;;  %3043 = vst [vmem:[#allocation40_spill] sm:$0xff] %v1338_v39  ;;  %v1418_v8 = vadd.f32 3.0, %v1273_v13  ;;  %v1421_v10 = vadd.f32 3.0, %v1276_v15  ;;  %v1424_v12 = vadd.f32 3.0, %v1282_v18 }
  0x36   :  { %3044 = vst [vmem:[#allocation41_spill] sm:$0xff] %v1341_v40  ;;  %3045 = vst [vmem:[#allocation42_spill] sm:$0xff] %v1344_v41  ;;  %v1427_v14 = vadd.f32 3.0, %v1293_v22  ;;  %v1439_v17 = vadd.f32 3.0, %v1323_v34  ;;  %v1442_v0 = vadd.f32 3.0, %v1325_v35  ;;  %p1187_p6 = pnand %p1186_p5, %p1180_p2 }
  0x37   :  { %v63_v24 = vadd.f32 %v62_v16, %v1282_v18  ;;  %3046 = vst [vmem:[#allocation43_spill] sm:$0xff] %v1357_v46  ;;  %3047 = vst [vmem:[#allocation44_spill] sm:$0xff] %v1360_v47  ;;  %v1430_v16 = vadd.f32 3.0, %v1295_v23 }
  0x38   :  { %3048 = vst [vmem:[#allocation45_spill] sm:$0xff] %v1363_v48  ;;  %3049 = vst [vmem:[#allocation46_spill] sm:$0xff] %v1366_v49 }
  0x39   :  { %v64_v44 = vadd.f32 %v63_v24, %v1293_v22  ;;  %3050 = vst [vmem:[#allocation47_spill] sm:$0xff] %v1369_v50  ;;  %3051 = vst [vmem:[#allocation48_spill] sm:$0xff] %v1372_v51  ;;  %v1433_v24 = vadd.f32 3.0, %v1307_v28 }
  0x3a   :  { %3052 = vst [vmem:[#allocation49_spill] sm:$0xff] %v1375_v52  ;;  %3053 = vst [vmem:[#allocation50_spill] sm:$0xff] %v1387_v56  ;;  %v1455_v56 = vmul.f32 %v1291_v21, %v1261_v5  ;;  %v1475_v21 = vmul.f32 %v1315_v31, %v1276_v15  ;;  %v1495_v31 = vmul.f32 %v1334_v38, %v1309_v29 }
  0x3b   :  { %3054 = vst [vmem:[#allocation51_spill] sm:$0xff] %v1390_v57  ;;  %3055 = vst [vmem:[#allocation52_spill] sm:$0xff] %v1393_v58  ;;  %v65_v60 = vadd.f32 %v64_v44, %v1295_v23  ;;  %v1436_v44 = vadd.f32 3.0, %v1309_v29  ;;  %v1447_v58 = vmul.f32 %v1285_v19, %v1254_v1  ;;  %v1451_v57 = vmul.f32 %v1288_v20, %v1258_v3 }
  0x3c   :  { %3056 = vst [vmem:[#allocation53_spill] sm:$0xff] %v1396_v59  ;;  %3057 = vst [vmem:[#allocation54_spill] sm:$0xff] %v1400_v61  ;;  %v1471_v20 = vmul.f32 %v1312_v30, %v1273_v13  ;;  %v1491_v30 = vmul.f32 %v1331_v37, %v1307_v28  ;;  %v135_v37 = vmul.f32 %v1400_v61, %v1350_v43 }
  0x3d   :  { %3058 = vst [vmem:[#allocation55_spill] sm:$0xff] %v1403_v62  ;;  %3059 = vst [vmem:[#allocation56_spill] sm:$0xff] %v1406_v63  ;;  %v66_v39 = vadd.f32 %v65_v60, %v1307_v28  ;;  %v1467_v60 = vmul.f32 %v1305_v27, %v1270_v11  ;;  %v1487_v27 = vmul.f32 %v1328_v36, %v1295_v23 }
  0x3e   :  { %3060 = vst [vmem:[#allocation57_spill] sm:$0xff] %v1409_v2  ;;  %3061 = vst [vmem:[#allocation58_spill] sm:$0xff] %v1412_v4  ;;  %v134_v36 = vmul.f32 %v1396_v59, %v1347_v42  ;;  %v136_v38 = vmul.f32 %v1403_v62, %v1354_v45  ;;  %v137_v28 = vmul.f32 %v1406_v63, %v1357_v46 }
  0x3f   :  { %3062 = vst [vmem:[#allocation59_spill] sm:$0xff] %v1415_v6  ;;  %3063 = vst [vmem:[#allocation60_spill] sm:$0xff] %v1418_v8  ;;  %v141_v59 = vmul.f32 %v1418_v8, %v1369_v50  ;;  %v142_v61 = vmul.f32 %v1421_v10, %v1372_v51  ;;  %v143_v62 = vmul.f32 %v1424_v12, %v1375_v52  ;;  %v3091_v52 = vld [vmem:[#allocation40_spill] sm:$0xff] }
  0x40   :  { %3064 = vst [vmem:[#allocation61_spill] sm:$0xff] %v1421_v10  ;;  %3065 = vst [vmem:[#allocation62_spill] sm:$0xff] %v1424_v12  ;;  %v144_v63 = vmul.f32 %v1427_v14, %v1378_v53  ;;  %v1540_v46 = vmul.f32 %v134_v36, %v3091_v52 }
  0x41   :  { %3066 = vst [vmem:[#allocation63_spill] sm:$0xff] %v1427_v14  ;;  %3067 = vst [vmem:[#allocation64_spill] sm:$0xff] %v1430_v16  ;;  %v1543_v14 = vmul.f32 %v135_v37, %v1447_v58 }
  0x42   :  { %3068 = vst [vmem:[#allocation65_spill] sm:$0xff] %v1433_v24  ;;  %3069 = vst [vmem:[#allocation66_spill] sm:$0xff] %v1436_v44  ;;  %v3089_v51 = vld [vmem:[#allocation52_spill] sm:$0xff] }
  0x43   :  { %3070 = vst [vmem:[#allocation67_spill] sm:$0xff] %v1439_v17  ;;  %3071 = vst [vmem:[#allocation68_spill] sm:$0xff] %v1442_v0  ;;  %v1459_v17 = vmul.f32 %v1299_v25, %v1264_v7  ;;  %v1463_v0 = vmul.f32 %v1302_v26, %v1267_v9  ;;  %v1479_v25 = vmul.f32 %v1318_v32, %v1282_v18 }
  0x44   :  { %3072 = vst [vmem:[#allocation69_spill] sm:$0xff] %v1451_v57  ;;  %3073 = vst [vmem:[#allocation70_spill] sm:$0xff] %v1455_v56  ;;  %v1483_v26 = vmul.f32 %v1321_v33, %v1293_v22  ;;  %v1499_v32 = vmul.f32 %v1341_v40, %v1323_v34  ;;  %v1503_v33 = vmul.f32 %v1344_v41, %v1325_v35 }
  0x45   :  { %3074 = vst [vmem:[#allocation71_spill] sm:$0xff] %v1459_v17  ;;  %3075 = vst [vmem:[#allocation72_spill] sm:$0xff] %v1463_v0  ;;  %v67_v22 = vadd.f32 %v66_v39, %v1309_v29  ;;  %v138_v40 = vmul.f32 %v1409_v2, %v1360_v47  ;;  %v139_v41 = vmul.f32 %v1412_v4, %v1363_v48  ;;  %v3086_v48 = vld [vmem:[#allocation50_spill] sm:$0xff] }
  0x46   :  { %3076 = vst [vmem:[#allocation73_spill] sm:$0xff] %v1467_v60  ;;  %3077 = vst [vmem:[#allocation74_spill] sm:$0xff] %v1471_v20  ;;  %v140_v39 = vmul.f32 %v1415_v6, %v1366_v49  ;;  %v145_v2 = vmul.f32 %v1430_v16, %v1381_v54  ;;  %v146_v4 = vmul.f32 %v1433_v24, %v1384_v55  ;;  %v3087_v49 = vld [vmem:[#allocation51_spill] sm:$0xff] }
  0x47   :  { %3078 = vst [vmem:[#allocation75_spill] sm:$0xff] %v1475_v21  ;;  %3079 = vst [vmem:[#allocation76_spill] sm:$0xff] %v1479_v25  ;;  %v147_v6 = vmul.f32 %v1436_v44, %v3086_v48  ;;  %v68_v10 = vadd.f32 %v67_v22, %v1323_v34  ;;  %v1546_v16 = vmul.f32 %v136_v38, %v1451_v57 }
  0x48   :  { %3080 = vst [vmem:[#allocation77_spill] sm:$0xff] %v1483_v26  ;;  %3081 = vst [vmem:[#allocation78_spill] sm:$0xff] %v1487_v27  ;;  %v1549_v24 = vmul.f32 %v137_v28, %v1455_v56  ;;  %v1552_v44 = vmul.f32 %v138_v40, %v1459_v17  ;;  %v1555_v22 = vmul.f32 %v139_v41, %v1463_v0 }
  0x49   :  { %3082 = vst [vmem:[#allocation79_spill] sm:$0xff] %v1491_v30  ;;  %3083 = vst [vmem:[#allocation80_spill] sm:$0xff] %v1495_v31 }
  0x4a   :  { %3084 = vst [vmem:[#allocation81_spill] sm:$0xff] %v1499_v32  ;;  %3085 = vst [vmem:[#allocation82_spill] sm:$0xff] %v1503_v33  ;;  %v3088_v8 = vld [vmem:[#allocation67_spill] sm:$0xff]  ;;  %v3090_v47 = vld [vmem:[#allocation68_spill] sm:$0xff] }
  0x4b   :  { %v148_v50 = vmul.f32 %v3088_v8, %v3087_v49  ;;  %v149_v12 = vmul.f32 %v3090_v47, %v3089_v51  ;;  %3092 = vst [vmem:[#allocation50_spill] sm:$0xff] %v1540_v46  ;;  %3093 = vst [vmem:[#allocation51_spill] sm:$0xff] %v1543_v14  ;;  %v1558_v47 = vmul.f32 %v140_v39, %v1467_v60 }
  0x4c   :  { %3094 = vst [vmem:[#allocation67_spill] sm:$0xff] %v1546_v16  ;;  %3095 = vst [vmem:[#allocation52_spill] sm:$0xff] %v1549_v24  ;;  %v1561_v46 = vmul.f32 %v141_v59, %v1471_v20  ;;  %v1564_v14 = vmul.f32 %v142_v61, %v1475_v21  ;;  %v1567_v16 = vmul.f32 %v143_v62, %v1479_v25  ;;  %v3122_v21 = vld [vmem:[#allocation29_spill] sm:$0xff] }
  0x4d   :  { %3096 = vst [vmem:[#allocation40_spill] sm:$0xff] %v1552_v44  ;;  %3097 = vst [vmem:[#allocation83_spill] sm:$0xff] %v1555_v22  ;;  %v1570_v24 = vmul.f32 %v144_v63, %v1483_v26  ;;  %v1573_v44 = vmul.f32 %v145_v2, %v1487_v27  ;;  %v1576_v22 = vmul.f32 %v146_v4, %v1491_v30  ;;  %v3109_v26 = vld [vmem:[#allocation11_spill] sm:$0xff]  ;;  %v3119_v27 = vld [vmem:[#allocation24_spill] sm:$0xff] }
  0x4e   :  { %3098 = vst [vmem:[#allocation84_spill] sm:$0xff] %v1558_v47  ;;  %3099 = vst [vmem:[#allocation85_spill] sm:$0xff] %v1561_v46  ;;  %v1579_v47 = vmul.f32 %v147_v6, %v1495_v31  ;;  %v1582_v46 = vadd.f32 %v68_v10, %v1325_v35  ;;  %v3113_v10 = vld [vmem:[#allocation26_spill] sm:$0xff] }
  0x4f   :  { %3100 = vst [vmem:[#allocation86_spill] sm:$0xff] %v1564_v14  ;;  %3101 = vst [vmem:[#allocation87_spill] sm:$0xff] %v1567_v16  ;;  %v1585_v14 = vmul.f32 %v148_v50, %v1499_v32  ;;  %v1588_v16 = vmul.f32 %v149_v12, %v1503_v33 }
  0x50   :  { %3102 = vst [vmem:[#allocation88_spill] sm:$0xff] %v1570_v24  ;;  %3103 = vst [vmem:[#allocation89_spill] sm:$0xff] %v1573_v44  ;;  %v3110_v24 = vld [vmem:[#allocation20_spill] sm:$0xff]  ;;  %v167_v44 = vadd.f32 %v1285_v19, %v1254_v1 }
  0x51   :  { %3104 = vst [vmem:[#allocation90_spill] sm:$0xff] %v1576_v22  ;;  %3105 = vst [vmem:[#allocation91_spill] sm:$0xff] %v1579_v47  ;;  %v166_v25 = vadd.f32 %v3110_v24, %v3109_v26  ;;  %v3111_v22 = vld [vmem:[#allocation22_spill] sm:$0xff]  ;;  %v3112_v47 = vld [vmem:[#allocation23_spill] sm:$0xff] }
  0x52   :  { %3106 = vst [vmem:[#allocation92_spill] sm:$0xff] %v1582_v46  ;;  %3107 = vst [vmem:[#allocation93_spill] sm:$0xff] %v1585_v14  ;;  %v168_v30 = vadd.f32 %v3111_v22, %v1258_v3  ;;  %v169_v31 = vadd.f32 %v3112_v47, %v1261_v5  ;;  %v170_v46 = vadd.f32 %v3113_v10, %v1264_v7  ;;  %v3114_v14 = vld [vmem:[#allocation27_spill] sm:$0xff]  ;;  %v3117_v19 = vld [vmem:[#allocation32_spill] sm:$0xff] }
  0x53   :  { %3108 = vst [vmem:[#allocation94_spill] sm:$0xff] %v1588_v16  ;;  %v171_v32 = vadd.f32 %v3114_v14, %v1267_v9  ;;  %v3115_v16 = vld [vmem:[#allocation28_spill] sm:$0xff]  ;;  %v3116_v24 = vld [vmem:[#allocation31_spill] sm:$0xff]  ;;  %v174_v1 = vadd.f32 %v3117_v19, %v1276_v15  ;;  %v3118_v22 = vld [vmem:[#allocation33_spill] sm:$0xff]  ;;  %v182_v20 = vmul.f32 %v166_v25, %v134_v36 }
  0x54   :  { %v172_v33 = vadd.f32 %v3115_v16, %v1270_v11  ;;  %v173_v26 = vadd.f32 %v3116_v24, %v1273_v13  ;;  %v175_v3 = vadd.f32 %v3118_v22, %v1282_v18  ;;  %v3120_v47 = vld [vmem:[#allocation34_spill] sm:$0xff]  ;;  %v3121_v10 = vld [vmem:[#allocation37_spill] sm:$0xff]  ;;  %v3124_v16 = vld [vmem:[#allocation39_spill] sm:$0xff]  ;;  %v183_v22 = vmul.f32 %v167_v44, %v135_v37 }
  0x55   :  { %v176_v5 = vadd.f32 %v3120_v47, %v3119_v27  ;;  %v177_v7 = vadd.f32 %v3121_v10, %v1295_v23  ;;  %v3123_v14 = vld [vmem:[#allocation38_spill] sm:$0xff]  ;;  %v179_v11 = vadd.f32 %v3124_v16, %v1309_v29  ;;  %v3125_v24 = vld [vmem:[#allocation41_spill] sm:$0xff]  ;;  %v184_v18 = vmul.f32 %v168_v30, %v136_v38  ;;  %v3138_v37 = vld [vmem:[#allocation47_spill] sm:$0xff] }
  0x56   :  { %v178_v9 = vadd.f32 %v3123_v14, %v3122_v21  ;;  %v180_v13 = vadd.f32 %v3125_v24, %v1323_v34  ;;  %v3126_v19 = vld [vmem:[#allocation42_spill] sm:$0xff]  ;;  %v185_v60 = vmul.f32 %v169_v31, %v137_v28  ;;  %v186_v47 = vmul.f32 %v170_v46, %v138_v40  ;;  %v3127_v24 = vld [vmem:[#allocation53_spill] sm:$0xff]  ;;  %v3129_v28 = vld [vmem:[#allocation55_spill] sm:$0xff] }
  0x57   :  { %v181_v15 = vadd.f32 %v3126_v19, %v1325_v35  ;;  %v187_v27 = vmul.f32 %v171_v32, %v139_v41  ;;  %v188_v0 = vmul.f32 %v172_v33, %v140_v39  ;;  %v189_v10 = vmul.f32 %v173_v26, %v141_v59  ;;  %v3128_v25 = vld [vmem:[#allocation54_spill] sm:$0xff]  ;;  %v3130_v31 = vld [vmem:[#allocation43_spill] sm:$0xff]  ;;  %v3131_v32 = vld [vmem:[#allocation56_spill] sm:$0xff] }
  0x58   :  { %v190_v23 = vmul.f32 %v174_v1, %v142_v61  ;;  %v191_v17 = vmul.f32 %v175_v3, %v143_v62  ;;  %v192_v14 = vmul.f32 %v176_v5, %v144_v63  ;;  %v193_v21 = vmul.f32 %v177_v7, %v145_v2  ;;  %v3132_v1 = vld [vmem:[#allocation44_spill] sm:$0xff]  ;;  %v3133_v3 = vld [vmem:[#allocation57_spill] sm:$0xff]  ;;  %v3144_v59 = vld [vmem:[#allocation63_spill] sm:$0xff] }
  0x59   :  { %v194_v56 = vmul.f32 %v178_v9, %v146_v4  ;;  %v195_v16 = vmul.f32 %v179_v11, %v147_v6  ;;  %v196_v29 = vmul.f32 %v180_v13, %v148_v50  ;;  %v197_v57 = vmul.f32 %v181_v15, %v149_v12  ;;  %v3134_v7 = vld [vmem:[#allocation45_spill] sm:$0xff]  ;;  %v3135_v9 = vld [vmem:[#allocation58_spill] sm:$0xff]  ;;  %v3137_v15 = vld [vmem:[#allocation59_spill] sm:$0xff] }
  0x5a   :  { %v198_v34 = vadd.f32 %v3127_v24, %v1347_v42  ;;  %v199_v36 = vadd.f32 %v3128_v25, %v1350_v43  ;;  %v200_v30 = vadd.f32 %v3129_v28, %v1354_v45  ;;  %v201_v26 = vadd.f32 %v3131_v32, %v3130_v31  ;;  %v3136_v13 = vld [vmem:[#allocation46_spill] sm:$0xff]  ;;  %v3139_v38 = vld [vmem:[#allocation60_spill] sm:$0xff]  ;;  %v3141_v42 = vld [vmem:[#allocation61_spill] sm:$0xff] }
  0x5b   :  { %v202_v5 = vadd.f32 %v3133_v3, %v3132_v1  ;;  %v203_v11 = vadd.f32 %v3135_v9, %v3134_v7  ;;  %v204_v33 = vadd.f32 %v3137_v15, %v3136_v13  ;;  %v205_v40 = vadd.f32 %v3139_v38, %v3138_v37  ;;  %v3140_v41 = vld [vmem:[#allocation48_spill] sm:$0xff]  ;;  %v3142_v46 = vld [vmem:[#allocation49_spill] sm:$0xff]  ;;  %v3143_v45 = vld [vmem:[#allocation62_spill] sm:$0xff] }
  0x5c   :  { %v206_v43 = vadd.f32 %v3141_v42, %v3140_v41  ;;  %v207_v50 = vadd.f32 %v3143_v45, %v3142_v46  ;;  %v208_v61 = vadd.f32 %v3144_v59, %v1378_v53  ;;  %v3145_v62 = vld [vmem:[#allocation64_spill] sm:$0xff]  ;;  %v3146_v2 = vld [vmem:[#allocation65_spill] sm:$0xff]  ;;  %v3147_v6 = vld [vmem:[#allocation66_spill] sm:$0xff]  ;;  %v212_v44 = vadd.f32 %v3088_v8, %v3087_v49 }
  0x5d   :  { %v209_v63 = vadd.f32 %v3145_v62, %v1381_v54  ;;  %v210_v4 = vadd.f32 %v3146_v2, %v1384_v55  ;;  %v211_v12 = vadd.f32 %v3147_v6, %v3086_v48  ;;  %v3148_v39 = vld [vmem:[#allocation68_spill] sm:$0xff]  ;;  %v214_v24 = vmul.f32 %v198_v34, %v3091_v52  ;;  %v3149_v53 = vld [vmem:[#allocation69_spill] sm:$0xff]  ;;  %v3150_v31 = vld [vmem:[#allocation70_spill] sm:$0xff] }
  0x5e   :  { %v213_v19 = vadd.f32 %v3148_v39, %v3089_v51  ;;  %v215_v25 = vmul.f32 %v199_v36, %v1447_v58  ;;  %v216_v28 = vmul.f32 %v200_v30, %v3149_v53  ;;  %v217_v54 = vmul.f32 %v201_v26, %v3150_v31  ;;  %v3151_v32 = vld [vmem:[#allocation71_spill] sm:$0xff]  ;;  %v3152_v55 = vld [vmem:[#allocation72_spill] sm:$0xff]  ;;  %v3153_v7 = vld [vmem:[#allocation73_spill] sm:$0xff] }
  0x5f   :  { %v218_v1 = vmul.f32 %v202_v5, %v3151_v32  ;;  %v219_v3 = vmul.f32 %v203_v11, %v3152_v55  ;;  %v220_v48 = vmul.f32 %v204_v33, %v3153_v7  ;;  %v3154_v9 = vld [vmem:[#allocation74_spill] sm:$0xff]  ;;  %v3155_v49 = vld [vmem:[#allocation75_spill] sm:$0xff]  ;;  %v3156_v15 = vld [vmem:[#allocation76_spill] sm:$0xff]  ;;  %v1670_v46 = vadd.f32 %v214_v24, %v182_v20 }
  0x60   :  { %v221_v13 = vmul.f32 %v205_v40, %v3154_v9  ;;  %v222_v8 = vmul.f32 %v206_v43, %v3155_v49  ;;  %v223_v51 = vmul.f32 %v207_v50, %v3156_v15  ;;  %v3157_v37 = vld [vmem:[#allocation77_spill] sm:$0xff]  ;;  %v3158_v52 = vld [vmem:[#allocation78_spill] sm:$0xff]  ;;  %v3159_v36 = vld [vmem:[#allocation79_spill] sm:$0xff]  ;;  %v1672_v33 = vadd.f32 %v215_v25, %v183_v22 }
  0x61   :  { %v224_v34 = vmul.f32 %v208_v61, %v3157_v37  ;;  %v225_v58 = vmul.f32 %v209_v63, %v3158_v52  ;;  %v226_v30 = vmul.f32 %v210_v4, %v3159_v36  ;;  %v3160_v38 = vld [vmem:[#allocation80_spill] sm:$0xff]  ;;  %v3161_v41 = vld [vmem:[#allocation81_spill] sm:$0xff]  ;;  %v3162_v42 = vld [vmem:[#allocation82_spill] sm:$0xff]  ;;  %v1674_v40 = vadd.f32 %v216_v28, %v184_v18 }
  0x62   :  { %v227_v26 = vmul.f32 %v211_v12, %v3160_v38  ;;  %v228_v5 = vmul.f32 %v212_v44, %v3161_v41  ;;  %v229_v11 = vmul.f32 %v213_v19, %v3162_v42  ;;  %v1676_v43 = vadd.f32 %v217_v54, %v185_v60  ;;  %v3163_v45 = vld [vmem:[#allocation50_spill] sm:$0xff]  ;;  %v3164_v62 = vld [vmem:[#allocation51_spill] sm:$0xff]  ;;  %v3175_v39 = vld [vmem:[#allocation84_spill] sm:$0xff] }
  0x63   :  { %999 = vrcp.f32 %v3163_v45  ;;  %v1679_v50 = vadd.f32 %v218_v1, %v186_v47  ;;  %v1681_v59 = vadd.f32 %v219_v3, %v187_v27  ;;  %v1683_v61 = vadd.f32 %v220_v48, %v188_v0  ;;  %v3165_v18 = vld [vmem:[#allocation67_spill] sm:$0xff]  ;;  %v3166_v27 = vld [vmem:[#allocation52_spill] sm:$0xff]  ;;  %v3182_v53 = vld [vmem:[#allocation85_spill] sm:$0xff] }
  0x64   :  { %1001 = vrcp.f32 %v3164_v62  ;;  %v1686_v63 = vadd.f32 %v221_v13, %v189_v10  ;;  %v1688_v20 = vadd.f32 %v222_v8, %v190_v23  ;;  %v1690_v22 = vadd.f32 %v223_v51, %v191_v17  ;;  %v3167_v23 = vld [vmem:[#allocation40_spill] sm:$0xff]  ;;  %v3168_v17 = vld [vmem:[#allocation83_spill] sm:$0xff]  ;;  %v3183_v28 = vld [vmem:[#allocation17_spill] sm:$0xff] }
  0x65   :  { %1003 = vrcp.f32 %v3165_v18  ;;  %v1693_v60 = vadd.f32 %v224_v34, %v192_v14  ;;  %v1695_v2 = vadd.f32 %v225_v58, %v193_v21  ;;  %v1697_v47 = vadd.f32 %v226_v30, %v194_v56  ;;  %v3169_v6 = vld [vmem:[#allocation11_spill] sm:$0xff]  ;;  %v3171_v14 = vld [vmem:[#allocation12_spill] sm:$0xff]  ;;  %v3173_v56 = vld [vmem:[#allocation13_spill] sm:$0xff] }
  0x66   :  { %1005 = vrcp.f32 %v3166_v27  ;;  %v1700_v0 = vadd.f32 %v227_v26, %v195_v16  ;;  %v1702_v4 = vadd.f32 %v228_v5, %v196_v29  ;;  %v1704_v10 = vadd.f32 %v229_v11, %v197_v57  ;;  %v3176_v16 = vld [vmem:[#allocation14_spill] sm:$0xff]  ;;  %v3178_v57 = vld [vmem:[#allocation15_spill] sm:$0xff]  ;;  %v3180_v24 = vld [vmem:[#allocation16_spill] sm:$0xff] }
  0x67   :  { %1007 = vrcp.f32 %v3167_v23  ;;  %v1709_v12 = vadd.f32 4.0, %v3169_v6  ;;  %v1712_v21 = vadd.f32 4.0, %v3171_v14  ;;  %v1715_v44 = vadd.f32 4.0, %v3173_v56  ;;  %v3185_v54 = vld [vmem:[#allocation18_spill] sm:$0xff]  ;;  %v3187_v1 = vld [vmem:[#allocation19_spill] sm:$0xff]  ;;  %v3190_v7 = vld [vmem:[#allocation21_spill] sm:$0xff] }
  0x68   :  { %1009 = vrcp.f32 %v3168_v17  ;;  %v1719_v29 = vadd.f32 4.0, %v3176_v16  ;;  %v1722_v19 = vadd.f32 4.0, %v3178_v57  ;;  %v1725_v25 = vadd.f32 4.0, %v3180_v24  ;;  %v3189_v3 = vld [vmem:[#allocation86_spill] sm:$0xff]  ;;  %v3192_v9 = vld [vmem:[#allocation24_spill] sm:$0xff]  ;;  %v3194_v49 = vld [vmem:[#allocation25_spill] sm:$0xff] }
  0x69   :  { %3170 = vst [vmem:[#allocation20_spill] sm:$0xff] %v1709_v12  ;;  %3172 = vst [vmem:[#allocation22_spill] sm:$0xff] %v1712_v21  ;;  %1011 = vrcp.f32 %v3175_v39  ;;  %v1729_v31 = vadd.f32 4.0, %v3183_v28  ;;  %v1732_v32 = vadd.f32 4.0, %v3185_v54  ;;  %v1735_v55 = vadd.f32 4.0, %v3187_v1  ;;  %v3196_v15 = vld [vmem:[#allocation87_spill] sm:$0xff] }
  0x6a   :  { %3174 = vst [vmem:[#allocation23_spill] sm:$0xff] %v1715_v44  ;;  %3177 = vst [vmem:[#allocation26_spill] sm:$0xff] %v1719_v29  ;;  %1013 = vrcp.f32 %v3182_v53  ;;  %v1739_v48 = vadd.f32 4.0, %v3190_v7  ;;  %v1742_v13 = vadd.f32 4.0, %v3192_v9  ;;  %v1745_v8 = vadd.f32 4.0, %v3194_v49  ;;  %v3197_v51 = vld [vmem:[#allocation29_spill] sm:$0xff] }
  0x6b   :  { %3179 = vst [vmem:[#allocation27_spill] sm:$0xff] %v1722_v19  ;;  %3181 = vst [vmem:[#allocation28_spill] sm:$0xff] %v1725_v25  ;;  %1015 = vrcp.f32 %v3189_v3  ;;  %v1749_v37 = vadd.f32 4.0, %v3197_v51  ;;  %v3199_v34 = vld [vmem:[#allocation30_spill] sm:$0xff]  ;;  %v3201_v58 = vld [vmem:[#allocation35_spill] sm:$0xff]  ;;  %v1759_v26 = vadd.f32 4.0, %v1325_v35 }
  0x6c   :  { %3184 = vst [vmem:[#allocation31_spill] sm:$0xff] %v1729_v31  ;;  %3186 = vst [vmem:[#allocation32_spill] sm:$0xff] %v1732_v32  ;;  %1017 = vrcp.f32 %v3196_v15  ;;  %v1752_v52 = vadd.f32 4.0, %v3199_v34  ;;  %v1755_v36 = vadd.f32 4.0, %v3201_v58  ;;  %v3203_v38 = vld [vmem:[#allocation88_spill] sm:$0xff]  ;;  %v1762_v41 = vadd.f32 -0.5, %v1709_v12 }
  0x6d   :  { %3188 = vst [vmem:[#allocation33_spill] sm:$0xff] %v1735_v55  ;;  %3191 = vst [vmem:[#allocation34_spill] sm:$0xff] %v1739_v48  ;;  %v1000_v30 = vpop.eup %999  ;;  %1019 = vrcp.f32 %v3203_v38  ;;  %v1765_v5 = vadd.f32 -0.5, %v1712_v21  ;;  %v3207_v11 = vld [vmem:[#allocation89_spill] sm:$0xff]  ;;  %v1769_v34 = vadd.f32 -0.5, %v1715_v44  ;;  %v1772_v58 = vadd.f32 -0.5, %v1719_v29 }
  0x6e   :  { %3193 = vst [vmem:[#allocation37_spill] sm:$0xff] %v1742_v13  ;;  %3195 = vst [vmem:[#allocation38_spill] sm:$0xff] %v1745_v8  ;;  %v1002_v42 = vpop.eup %1001  ;;  %1021 = vrcp.f32 %v3207_v11  ;;  %v1775_v51 = vadd.f32 -0.5, %v1722_v19  ;;  %v3211_v49 = vld [vmem:[#allocation90_spill] sm:$0xff]  ;;  %v3212_v9 = vld [vmem:[#allocation92_spill] sm:$0xff]  ;;  %v1793_v57 = vadd.f32 -0.5, %v1735_v55 }
  0x6f   :  { %3198 = vst [vmem:[#allocation39_spill] sm:$0xff] %v1749_v37  ;;  %3200 = vst [vmem:[#allocation41_spill] sm:$0xff] %v1752_v52  ;;  %v1004_v35 = vpop.eup %1003  ;;  %1023 = vrcp.f32 %v3211_v49  ;;  %v711_v7 = vadd.f32 2.0, %v3212_v9  ;;  %v3213_v54 = vld [vmem:[#allocation91_spill] sm:$0xff]  ;;  %v3217_v24 = vld [vmem:[#allocation93_spill] sm:$0xff]  ;;  %v1796_v16 = vadd.f32 -0.5, %v1739_v48 }
  0x70   :  { %3202 = vst [vmem:[#allocation42_spill] sm:$0xff] %v1755_v36  ;;  %3204 = vst [vmem:[#allocation53_spill] sm:$0xff] %v1759_v26  ;;  %v1006_v1 = vpop.eup %1005  ;;  %1025 = vrcp.f32 %v3213_v54  ;;  %v1799_v56 = vadd.f32 -0.5, %v1742_v13 }
  0x71   :  { %3205 = vst [vmem:[#allocation54_spill] sm:$0xff] %v1762_v41  ;;  %3206 = vst [vmem:[#allocation55_spill] sm:$0xff] %v1765_v5  ;;  %v710_v41 = vadd.f32 1.0, %v3212_v9  ;;  %v712_v5 = vadd.f32 3.0, %v3212_v9  ;;  %v1008_v28 = vpop.eup %1007  ;;  %1027 = vrcp.f32 %v3217_v24 }
  0x72   :  { %3208 = vst [vmem:[#allocation43_spill] sm:$0xff] %v1769_v34  ;;  %3209 = vst [vmem:[#allocation56_spill] sm:$0xff] %v1772_v58  ;;  %v1783_v34 = vadd.f32 -0.5, %v1725_v25  ;;  %v1786_v58 = vadd.f32 -0.5, %v1729_v31  ;;  %v1010_v14 = vpop.eup %1009 }
  0x73   :  { %3210 = vst [vmem:[#allocation44_spill] sm:$0xff] %v1775_v51  ;;  %v1789_v51 = vadd.f32 -0.5, %v1732_v32  ;;  %3218 = vst [vmem:[#allocation46_spill] sm:$0xff] %v1793_v57  ;;  %v1809_v32 = vadd.f32 -0.5, %v1752_v52  ;;  %v1012_v55 = vpop.eup %1011  ;;  %v1811_v57 = vld [vmem:[#allocation5] sm:$0xff]  ;;  %v716_v13 = vadd.f32 %v710_v41, %v3212_v9 }
  0x74   :  { %3214 = vst [vmem:[#allocation57_spill] sm:$0xff] %v1783_v34  ;;  %3215 = vst [vmem:[#allocation45_spill] sm:$0xff] %v1786_v58  ;;  %v3221_v34 = vld [vmem:[#allocation94_spill] sm:$0xff]  ;;  %v1803_v58 = vadd.f32 -0.5, %v1745_v8  ;;  %v1014_v48 = vpop.eup %1013  ;;  %v1830_v8 = vmul.f32 %v1004_v35, %v1674_v40  ;;  %vm750_vm0 = vcmp.eq.s32.totalorder %v1811_v57, 0  ;;  %vm751_vm1 = vcmp.eq.s32.totalorder %v1811_v57, 1 }
  0x75   :  { %3216 = vst [vmem:[#allocation58_spill] sm:$0xff] %v1789_v51  ;;  %3219 = vst [vmem:[#allocation59_spill] sm:$0xff] %v1796_v16  ;;  %1029 = vrcp.f32 %v3221_v34  ;;  %v1806_v51 = vadd.f32 -0.5, %v1749_v37  ;;  %v713_v16 = vmul.f32 %v710_v41, %v3212_v9  ;;  %v1016_v52 = vpop.eup %1015  ;;  %v1824_v37 = vmul.f32 %v1000_v30, %v1670_v46 }
  0x76   :  { %3220 = vst [vmem:[#allocation47_spill] sm:$0xff] %v1799_v56  ;;  %3222 = vst [vmem:[#allocation60_spill] sm:$0xff] %v1803_v58  ;;  %1031 = vlog2.f32 %v3163_v45  ;;  %v714_v56 = vmul.f32 %v712_v5, %v711_v7  ;;  %v1818_v58 = vadd.f32 -0.5, %v1755_v36  ;;  %v1827_v45 = vmul.f32 %v1002_v42, %v1672_v33 }
  0x77   :  { %3223 = vst [vmem:[#allocation48_spill] sm:$0xff] %v1806_v51  ;;  %3224 = vst [vmem:[#allocation61_spill] sm:$0xff] %v1809_v32  ;;  %1033 = vlog2.f32 %v3164_v62  ;;  %v1821_v51 = vadd.f32 -0.5, %v1759_v26  ;;  %v718_v32 = vadd.f32 %v712_v5, %v711_v7  ;;  %v1018_v62 = vpop.eup %1017  ;;  %v1834_v41 = vmul.f32 %v1006_v1, %v1676_v43 }
  0x78   :  { %3225 = vst [vmem:[#allocation49_spill] sm:$0xff] %v1818_v58  ;;  %3227 = vst [vmem:[#allocation63_spill] sm:$0xff] %v1824_v37  ;;  %1035 = vlog2.f32 %v3165_v18  ;;  %v1838_v7 = vadd.f32 4.0, %v3212_v9  ;;  %v1020_v46 = vpop.eup %1019  ;;  %v1842_v33 = vmul.f32 %v1008_v28, %v1679_v50  ;;  %v1845_v35 = vmul.f32 %v714_v56, %v713_v16 }
  0x79   :  { %3226 = vst [vmem:[#allocation62_spill] sm:$0xff] %v1821_v51  ;;  %3228 = vst [vmem:[#allocation64_spill] sm:$0xff] %v1827_v45  ;;  %1037 = vlog2.f32 %v3166_v27  ;;  %v1847_v40 = vmul.f32 %v716_v13, %v714_v56  ;;  %v1022_v18 = vpop.eup %1021  ;;  %v1850_v43 = vmul.f32 %v1010_v14, %v1681_v59  ;;  %v1853_v27 = vmul.f32 %v718_v32, %v713_v16 }
  0x7a   :  { %3229 = vst [vmem:[#allocation65_spill] sm:$0xff] %v1830_v8  ;;  %3230 = vst [vmem:[#allocation66_spill] sm:$0xff] %v1834_v41  ;;  %1039 = vlog2.f32 %v3167_v23  ;;  %v1024_v1 = vpop.eup %1023  ;;  %v1857_v50 = vmul.f32 %v1012_v55, %v1683_v61  ;;  %vm752_vm2 = vcmp.eq.s32.totalorder %v1811_v57, 2  ;;  %vm753_vm3 = vcmp.eq.s32.totalorder %v1811_v57, 3 }
  0x7b   :  { %3231 = vst [vmem:[#allocation68_spill] sm:$0xff] %v1838_v7  ;;  %3232 = vst [vmem:[#allocation69_spill] sm:$0xff] %v1842_v33  ;;  %1041 = vlog2.f32 %v3168_v17  ;;  %v1026_v23 = vpop.eup %1025  ;;  %v1863_v59 = vmul.f32 %v1014_v48, %v1686_v63  ;;  %v1866_v17 = vmul.f32 %v1016_v52, %v1688_v20  ;;  %vm754_vm4 = vcmp.eq.s32.totalorder %v1811_v57, 4 }
  0x7c   :  { %3233 = vst [vmem:[#allocation70_spill] sm:$0xff] %v1845_v35  ;;  %3234 = vst [vmem:[#allocation71_spill] sm:$0xff] %v1847_v40  ;;  %1043 = vlog2.f32 %v3175_v39  ;;  %v1028_v14 = vpop.eup %1027  ;;  %v1871_v61 = vmul.f32 %v1018_v62, %v1690_v22  ;;  %vm755_vm5 = vcmp.eq.s32.totalorder %v1811_v57, 5  ;;  %vm756_vm6 = vcmp.eq.s32.totalorder %v1811_v57, 6  ;;  %v3277_v35 = vld [vmem:[#allocation33_spill] sm:$0xff] }
  0x7d   :  { %3235 = vst [vmem:[#allocation72_spill] sm:$0xff] %v1850_v43  ;;  %3236 = vst [vmem:[#allocation73_spill] sm:$0xff] %v1853_v27  ;;  %1045 = vlog2.f32 %v3182_v53  ;;  %v1877_v63 = vmul.f32 %v1020_v46, %v1693_v60  ;;  %vm757_vm7 = vcmp.eq.s32.totalorder %v1811_v57, 7  ;;  %vm758_vm8 = vcmp.eq.s32.totalorder %v1811_v57, 8 }
  0x7e   :  { %3237 = vst [vmem:[#allocation74_spill] sm:$0xff] %v1857_v50  ;;  %3238 = vst [vmem:[#allocation75_spill] sm:$0xff] %v1863_v59  ;;  %1047 = vlog2.f32 %v3189_v3  ;;  %vm759_vm9 = vcmp.eq.s32.totalorder %v1811_v57, 9  ;;  %vm760_vm10 = vcmp.eq.s32.totalorder %v1811_v57, 10  ;;  %v1886_v39 = vmul.f32 %v1022_v18, %v1695_v2 }
  0x7f   :  { %3239 = vst [vmem:[#allocation76_spill] sm:$0xff] %v1866_v17  ;;  %3240 = vst [vmem:[#allocation77_spill] sm:$0xff] %v1871_v61  ;;  %v1030_v56 = vpop.eup %1029  ;;  %1049 = vlog2.f32 %v3196_v15  ;;  %vm761_vm11 = vcmp.eq.s32.totalorder %v1811_v57, 11  ;;  %vm762_vm12 = vcmp.eq.s32.totalorder %v1811_v57, 12  ;;  %v1892_v16 = vmul.f32 %v1024_v1, %v1697_v47 }
  0x80   :  { %3241 = vst [vmem:[#allocation78_spill] sm:$0xff] %v1877_v63  ;;  %v1032_v20 = vpop.eup %1031  ;;  %1051 = vlog2.f32 %v3203_v38  ;;  %3242 = vst [vmem:[#allocation79_spill] sm:$0xff] %v1886_v39  ;;  %v1895_v53 = vmul.f32 %v1026_v23, %v1700_v0  ;;  %vm763_vm13 = vcmp.eq.s32.totalorder %v1811_v57, 13  ;;  %v1900_v2 = vmul.f32 %v1028_v14, %v1702_v4 }
  0x81   :  { %v1034_v22 = vpop.eup %1033  ;;  %1053 = vlog2.f32 %v3207_v11  ;;  %3243 = vst [vmem:[#allocation80_spill] sm:$0xff] %v1892_v16  ;;  %v1211_v32 = vmov 0.0   ;;  %v1912_v3 = vmul.f32 %v1030_v56, %v1704_v10  ;;  %v1916_v4 = vadd.f32 -0.5, %v1838_v7 }
  0x82   :  { %v1036_v60 = vpop.eup %1035  ;;  %3244 = vst [vmem:[#allocation81_spill] sm:$0xff] %v1895_v53  ;;  %1055 = vlog2.f32 %v3211_v49  ;;  %3245 = vst [vmem:[#allocation82_spill] sm:$0xff] %v1900_v2  ;;  %v1905_v55 = vsel %vm750_vm0, 1.0, %v1211_v32  ;;  %v1909_v47 = vsel %vm751_vm1, 1.0, %v1211_v32  ;;  %vm764_vm14 = vcmp.eq.s32.totalorder %v1811_v57, 14 }
  0x83   :  { %v1038_v28 = vpop.eup %1037  ;;  %1057 = vlog2.f32 %v3213_v54  ;;  %3246 = vst [vmem:[#allocation50_spill] sm:$0xff] %v1905_v55  ;;  %3247 = vst [vmem:[#allocation51_spill] sm:$0xff] %v1909_v47  ;;  %v1919_v48 = vmul.f32 0.6931472, %v1032_v20  ;;  %v1924_v13 = vsel %vm752_vm2, 1.0, %v1211_v32  ;;  %v1928_v10 = vsel %vm753_vm3, 1.0, %v1211_v32 }
  0x84   :  { %v1040_v0 = vpop.eup %1039  ;;  %3248 = vst [vmem:[#allocation67_spill] sm:$0xff] %v1912_v3  ;;  %1059 = vlog2.f32 %v3217_v24  ;;  %3249 = vst [vmem:[#allocation52_spill] sm:$0xff] %v1916_v4  ;;  %v1930_v24 = vmul.f32 0.6931472, %v1034_v22  ;;  %vm765_vm15 = vcmp.eq.s32.totalorder %v1811_v57, 15  ;;  %v1936_v15 = vsel %vm754_vm4, 1.0, %v1211_v32 }
  0x85   :  { %v1042_v54 = vpop.eup %1041  ;;  %3250 = vst [vmem:[#allocation40_spill] sm:$0xff] %v1919_v48  ;;  %1061 = vlog2.f32 %v3221_v34  ;;  %3251 = vst [vmem:[#allocation83_spill] sm:$0xff] %v1924_v13  ;;  %v1938_v52 = vmul.f32 0.6931472, %v1036_v60  ;;  %v1943_v30 = vsel %vm755_vm5, 1.0, %v1211_v32  ;;  %v1947_v38 = vsel %vm756_vm6, 1.0, %v1211_v32 }
  0x86   :  { %3252 = vst [vmem:[#allocation11_spill] sm:$0xff] %v1928_v10  ;;  %v1044_v49 = vpop.eup %1043  ;;  %3253 = vst [vmem:[#allocation84_spill] sm:$0xff] %v1930_v24  ;;  %1063 = vrcp.f32 %v1709_v12  ;;  %v1949_v42 = vmul.f32 0.6931472, %v1038_v28  ;;  %v1954_v11 = vsel %vm757_vm7, 1.0, %v1211_v32  ;;  %v1958_v62 = vsel %vm758_vm8, 1.0, %v1211_v32 }
  0x87   :  { %3254 = vst [vmem:[#allocation85_spill] sm:$0xff] %v1936_v15  ;;  %v1046_v34 = vpop.eup %1045  ;;  %3255 = vst [vmem:[#allocation86_spill] sm:$0xff] %v1938_v52  ;;  %1065 = vrcp.f32 %v1712_v21  ;;  %v1960_v18 = vmul.f32 0.6931472, %v1040_v0  ;;  %v1965_v1 = vsel %vm759_vm9, 1.0, %v1211_v32  ;;  %v1969_v23 = vsel %vm760_vm10, 1.0, %v1211_v32 }
  0x88   :  { %3256 = vst [vmem:[#allocation87_spill] sm:$0xff] %v1943_v30  ;;  %3257 = vst [vmem:[#allocation88_spill] sm:$0xff] %v1947_v38  ;;  %v1048_v5 = vpop.eup %1047  ;;  %1067 = vrcp.f32 %v1715_v44  ;;  %v1971_v56 = vmul.f32 0.6931472, %v1042_v54  ;;  %v1976_v20 = vsel %vm761_vm11, 1.0, %v1211_v32  ;;  %v1980_v22 = vsel %vm762_vm12, 1.0, %v1211_v32 }
  0x89   :  { %3258 = vst [vmem:[#allocation89_spill] sm:$0xff] %v1949_v42  ;;  %3259 = vst [vmem:[#allocation90_spill] sm:$0xff] %v1954_v11  ;;  %v1050_v46 = vpop.eup %1049  ;;  %1069 = vrcp.f32 %v1719_v29  ;;  %v1982_v28 = vmul.f32 0.6931472, %v1044_v49  ;;  %v1987_v0 = vsel %vm763_vm13, 1.0, %v1211_v32  ;;  %v1991_v54 = vsel %vm764_vm14, 1.0, %v1211_v32 }
  0x8a   :  { %3260 = vst [vmem:[#allocation91_spill] sm:$0xff] %v1958_v62  ;;  %3261 = vst [vmem:[#allocation93_spill] sm:$0xff] %v1960_v18  ;;  %v1052_v14 = vpop.eup %1051  ;;  %1071 = vrcp.f32 %v1722_v19  ;;  %v1993_v27 = vmul.f32 0.6931472, %v1046_v34  ;;  %v1998_v40 = vsel %vm765_vm15, 1.0, %v1211_v32  ;;  %v977_v49 = vadd.f32 -1.0, %v3169_v6 }
  0x8b   :  { %3262 = vst [vmem:[#allocation94_spill] sm:$0xff] %v1965_v1  ;;  %3263 = vst [vmem:[#allocation95_spill] sm:$0xff] %v1969_v23  ;;  %v1054_v60 = vpop.eup %1053  ;;  %1073 = vrcp.f32 %v1725_v25  ;;  %v3273_v4 = vld [vmem:[#allocation32_spill] sm:$0xff]  ;;  %v3275_v1 = vld [vmem:[#allocation13_spill] sm:$0xff]  ;;  %v2006_v34 = vmul.f32 0.6931472, %v1050_v46 }
  0x8c   :  { %3264 = vst [vmem:[#allocation96_spill] sm:$0xff] %v1971_v56  ;;  %3265 = vst [vmem:[#allocation97_spill] sm:$0xff] %v1976_v20  ;;  %v1056_v9 = vpop.eup %1055  ;;  %1075 = vrcp.f32 %v1729_v31  ;;  %v2001_v20 = vmul.f32 0.6931472, %v1048_v5  ;;  %v3278_v11 = vld [vmem:[#allocation14_spill] sm:$0xff]  ;;  %v3279_v32 = vld [vmem:[#allocation15_spill] sm:$0xff] }
  0x8d   :  { %3266 = vst [vmem:[#allocation98_spill] sm:$0xff] %v1980_v22  ;;  %3267 = vst [vmem:[#allocation99_spill] sm:$0xff] %v1982_v28  ;;  %v1058_v22 = vpop.eup %1057  ;;  %1077 = vrcp.f32 %v3273_v4  ;;  %v980_v57 = vadd.f32 -1.0, %v3278_v11  ;;  %v2011_v6 = vmul.f32 0.6931472, %v1052_v14  ;;  %v3281_v5 = vld [vmem:[#allocation34_spill] sm:$0xff] }
  0x8e   :  { %3268 = vst [vmem:[#allocation100_spill] sm:$0xff] %v1987_v0  ;;  %3269 = vst [vmem:[#allocation101_spill] sm:$0xff] %v1991_v54  ;;  %v3274_v0 = vld [vmem:[#allocation12_spill] sm:$0xff]  ;;  %v979_v54 = vadd.f32 -1.0, %v3275_v1  ;;  %v1060_v62 = vpop.eup %1059  ;;  %1079 = vrcp.f32 %v3277_v35  ;;  %v2022_v46 = vmul.f32 0.6931472, %v1054_v60 }
  0x8f   :  { %3270 = vst [vmem:[#allocation102_spill] sm:$0xff] %v1993_v27  ;;  %3271 = vst [vmem:[#allocation103_spill] sm:$0xff] %v1998_v40  ;;  %v978_v23 = vadd.f32 -1.0, %v3274_v0  ;;  %v981_v40 = vadd.f32 -1.0, %v3279_v32  ;;  %v1062_v38 = vpop.eup %1061  ;;  %1081 = vrcp.f32 %v3281_v5  ;;  %v3282_v30 = vld [vmem:[#allocation16_spill] sm:$0xff]  ;;  %v3284_v0 = vld [vmem:[#allocation17_spill] sm:$0xff] }
  0x90   :  { %3272 = vst [vmem:[#allocation104_spill] sm:$0xff] %v2001_v20  ;;  %3276 = vst [vmem:[#allocation12_spill] sm:$0xff] %v2006_v34  ;;  %v2015_v20 = vadd.f32 -1.0, %v3282_v30  ;;  %v2018_v15 = vadd.f32 -1.0, %v3284_v0  ;;  %v2020_v1 = vpop.eup %1063  ;;  %v3288_v34 = vld [vmem:[#allocation37_spill] sm:$0xff]  ;;  %v3289_v11 = vld [vmem:[#allocation18_spill] sm:$0xff] }
  0x91   :  { %3280 = vst [vmem:[#allocation13_spill] sm:$0xff] %v2011_v6  ;;  %3286 = vst [vmem:[#allocation16_spill] sm:$0xff] %v2020_v1  ;;  %1083 = vrcp.f32 %v3288_v34  ;;  %v2026_v27 = vadd.f32 -1.0, %v3289_v11  ;;  %v3291_v32 = vld [vmem:[#allocation19_spill] sm:$0xff]  ;;  %v2031_v6 = vpop.eup %1065  ;;  %v2033_v28 = vmul.f32 0.6931472, %v1056_v9 }
  0x92   :  { %3283 = vst [vmem:[#allocation14_spill] sm:$0xff] %v2015_v20  ;;  %3285 = vst [vmem:[#allocation15_spill] sm:$0xff] %v2018_v15  ;;  %v2029_v14 = vadd.f32 -1.0, %v3291_v32  ;;  %v3295_v30 = vld [vmem:[#allocation38_spill] sm:$0xff]  ;;  %v3296_v0 = vld [vmem:[#allocation21_spill] sm:$0xff] }
  0x93   :  { %3287 = vst [vmem:[#allocation17_spill] sm:$0xff] %v2022_v46  ;;  %3290 = vst [vmem:[#allocation18_spill] sm:$0xff] %v2026_v27  ;;  %1085 = vrcp.f32 %v3295_v30  ;;  %v2037_v15 = vadd.f32 -1.0, %v3296_v0  ;;  %v3298_v56 = vld [vmem:[#allocation24_spill] sm:$0xff]  ;;  %v2042_v46 = vpop.eup %1067  ;;  %v2044_v18 = vmul.f32 0.6931472, %v1058_v22 }
  0x94   :  { %3292 = vst [vmem:[#allocation19_spill] sm:$0xff] %v2029_v14  ;;  %3293 = vst [vmem:[#allocation105_spill] sm:$0xff] %v2031_v6  ;;  %v2040_v60 = vadd.f32 -1.0, %v3298_v56  ;;  %v3302_v11 = vld [vmem:[#allocation39_spill] sm:$0xff]  ;;  %v3303_v32 = vld [vmem:[#allocation25_spill] sm:$0xff] }
  0x95   :  { %3294 = vst [vmem:[#allocation106_spill] sm:$0xff] %v2033_v28  ;;  %3297 = vst [vmem:[#allocation21_spill] sm:$0xff] %v2037_v15  ;;  %1087 = vrcp.f32 %v3302_v11  ;;  %v2048_v14 = vadd.f32 -1.0, %v3303_v32  ;;  %v3305_v27 = vld [vmem:[#allocation29_spill] sm:$0xff]  ;;  %v2053_v28 = vpop.eup %1069  ;;  %v2055_v10 = vmul.f32 0.6931472, %v1060_v62 }
  0x96   :  { %3299 = vst [vmem:[#allocation24_spill] sm:$0xff] %v2040_v60  ;;  %3300 = vst [vmem:[#allocation107_spill] sm:$0xff] %v2042_v46  ;;  %v2051_v9 = vadd.f32 -1.0, %v3305_v27  ;;  %v3309_v0 = vld [vmem:[#allocation41_spill] sm:$0xff]  ;;  %v3310_v56 = vld [vmem:[#allocation30_spill] sm:$0xff]  ;;  %v2069_v27 = vmul.f32 %v2020_v1, %v2020_v1 }
  0x97   :  { %3301 = vst [vmem:[#allocation108_spill] sm:$0xff] %v2044_v18  ;;  %3304 = vst [vmem:[#allocation25_spill] sm:$0xff] %v2048_v14  ;;  %1089 = vrcp.f32 %v3309_v0  ;;  %v2059_v60 = vadd.f32 -1.0, %v3310_v56  ;;  %v3312_v15 = vld [vmem:[#allocation35_spill] sm:$0xff]  ;;  %v2064_v18 = vpop.eup %1071  ;;  %v3315_v32 = vld [vmem:[#allocation36_spill] sm:$0xff]  ;;  %v2104_v14 = vmul.f32 %v2053_v28, %v2053_v28 }
  0x98   :  { %3306 = vst [vmem:[#allocation29_spill] sm:$0xff] %v2051_v9  ;;  %3307 = vst [vmem:[#allocation109_spill] sm:$0xff] %v2053_v28  ;;  %v2062_v22 = vadd.f32 -1.0, %v3312_v15  ;;  %1091 = vrcp.f32 %v1755_v36  ;;  %v2072_v9 = vadd.f32 -1.0, %v3315_v32  ;;  %v2074_v62 = vmul.f32 0.001, %v977_v49 }
  0x99   :  { %3308 = vst [vmem:[#allocation110_spill] sm:$0xff] %v2055_v10  ;;  %3311 = vst [vmem:[#allocation30_spill] sm:$0xff] %v2059_v60  ;;  %v2076_v10 = vpop.eup %1073  ;;  %v2078_v56 = vmul.f32 0.6931472, %v1062_v38  ;;  %1093 = vrcp.f32 %v1759_v26  ;;  %v2083_v15 = vmul.f32 %v2031_v6, %v2031_v6  ;;  %v2091_v32 = vmul.f32 %v2042_v46, %v2042_v46 }
  0x9a   :  { %3313 = vst [vmem:[#allocation35_spill] sm:$0xff] %v2062_v22  ;;  %3314 = vst [vmem:[#allocation111_spill] sm:$0xff] %v2064_v18  ;;  %v2085_v22 = vmul.f32 0.001, %v978_v23  ;;  %v2087_v60 = vpop.eup %1075  ;;  %v2094_v49 = vmul.f32 0.5, %v2020_v1  ;;  %1095 = vlog2.f32 %v1709_v12  ;;  %v2108_v23 = vmul.f32 0.5, %v2031_v6 }
  0x9b   :  { %3316 = vst [vmem:[#allocation36_spill] sm:$0xff] %v2072_v9  ;;  %3317 = vst [vmem:[#allocation112_spill] sm:$0xff] %v2074_v62  ;;  %v2096_v9 = vmul.f32 0.001, %v979_v54  ;;  %v2098_v38 = vmul.f32 0.001, %v980_v57  ;;  %v2116_v54 = vmul.f32 %v2064_v18, %v2064_v18  ;;  %1097 = vlog2.f32 %v1712_v21 }
  0x9c   :  { %3318 = vst [vmem:[#allocation113_spill] sm:$0xff] %v2076_v10  ;;  %3319 = vst [vmem:[#allocation114_spill] sm:$0xff] %v2078_v56  ;;  %v2100_v56 = vpop.eup %1077  ;;  %v2110_v20 = vmul.f32 0.001, %v981_v40  ;;  %v2120_v57 = vmul.f32 0.5, %v2042_v46  ;;  %v2129_v40 = vmul.f32 %v2076_v10, %v2076_v10  ;;  %1099 = vlog2.f32 %v1715_v44 }
  0x9d   :  { %3320 = vst [vmem:[#allocation115_spill] sm:$0xff] %v2085_v22  ;;  %3321 = vst [vmem:[#allocation116_spill] sm:$0xff] %v2087_v60  ;;  %v2112_v42 = vpop.eup %1079  ;;  %v2142_v52 = vmul.f32 %v2087_v60, %v2087_v60  ;;  %1101 = vlog2.f32 %v1719_v29  ;;  %v2146_v2 = vmul.f32 0.5, %v2064_v18  ;;  %v2149_v53 = vmul.f32 0.003968254, %v2091_v32 }
  0x9e   :  { %3322 = vst [vmem:[#allocation117_spill] sm:$0xff] %v2094_v49  ;;  %3323 = vst [vmem:[#allocation118_spill] sm:$0xff] %v2096_v9  ;;  %v2125_v3 = vpop.eup %1081  ;;  %v2136_v9 = vmul.f32 0.003968254, %v2083_v15  ;;  %v2155_v47 = vmul.f32 %v2100_v56, %v2100_v56  ;;  %1103 = vlog2.f32 %v1722_v19  ;;  %v2159_v62 = vmul.f32 0.5, %v2076_v10 }
  0x9f   :  { %3324 = vst [vmem:[#allocation119_spill] sm:$0xff] %v2098_v38  ;;  %3325 = vst [vmem:[#allocation120_spill] sm:$0xff] %v2100_v56  ;;  %v2123_v38 = vmul.f32 0.003968254, %v2069_v27  ;;  %v2138_v13 = vpop.eup %1083  ;;  %v2162_v55 = vmul.f32 0.003968254, %v2104_v14  ;;  %v2168_v48 = vmul.f32 %v2112_v42, %v2112_v42  ;;  %1105 = vlog2.f32 %v1725_v25 }
  0xa0   :  { %3326 = vst [vmem:[#allocation121_spill] sm:$0xff] %v2108_v23  ;;  %3327 = vst [vmem:[#allocation122_spill] sm:$0xff] %v2110_v20  ;;  %v2133_v20 = vmul.f32 0.5, %v2053_v28  ;;  %v2151_v22 = vpop.eup %1085  ;;  %v2172_v7 = vmul.f32 0.5, %v2087_v60  ;;  %v2175_v18 = vmul.f32 0.003968254, %v2116_v54  ;;  %1107 = vlog2.f32 %v1729_v31 }
  0xa1   :  { %3328 = vst [vmem:[#allocation123_spill] sm:$0xff] %v2112_v42  ;;  %3329 = vst [vmem:[#allocation124_spill] sm:$0xff] %v2125_v3  ;;  %v2164_v24 = vpop.eup %1087  ;;  %v2181_v10 = vmul.f32 0.5, %v2100_v56  ;;  %v2184_v46 = vmul.f32 0.5, %v2112_v42  ;;  %v2187_v6 = vmul.f32 0.003968254, %v2129_v40  ;;  %v2193_v60 = vmul.f32 %v2125_v3, %v2125_v3 }
  0xa2   :  { %3330 = vst [vmem:[#allocation125_spill] sm:$0xff] %v2133_v20  ;;  %3331 = vst [vmem:[#allocation126_spill] sm:$0xff] %v2138_v13  ;;  %v2177_v28 = vpop.eup %1089  ;;  %1109 = vlog2.f32 %v3273_v4  ;;  %v2197_v16 = vmul.f32 0.5, %v2125_v3  ;;  %v2200_v56 = vmul.f32 0.003968254, %v2142_v52  ;;  %v2206_v42 = vmul.f32 %v2138_v13, %v2138_v13 }
  0xa3   :  { %3332 = vst [vmem:[#allocation127_spill] sm:$0xff] %v2146_v2  ;;  %3333 = vst [vmem:[#allocation128_spill] sm:$0xff] %v2151_v22  ;;  %v2189_v1 = vpop.eup %1091  ;;  %v2210_v63 = vmul.f32 %v2151_v22, %v2151_v22  ;;  %1111 = vlog2.f32 %v3277_v35  ;;  %v2214_v61 = vmul.f32 0.003968254, %v2155_v47  ;;  %v2218_v3 = vmul.f32 %v2164_v24, %v2164_v24 }
  0xa4   :  { %3334 = vst [vmem:[#allocation129_spill] sm:$0xff] %v2159_v62  ;;  %3335 = vst [vmem:[#allocation130_spill] sm:$0xff] %v2164_v24  ;;  %v2202_v39 = vpop.eup %1093  ;;  %1113 = vlog2.f32 %v3281_v5  ;;  %v2222_v17 = vmul.f32 0.5, %v2138_v13  ;;  %v2225_v59 = vmul.f32 0.003968254, %v2168_v48  ;;  %v2229_v43 = vmul.f32 %v2177_v28, %v2177_v28 }
  0xa5   :  { %3336 = vst [vmem:[#allocation131_spill] sm:$0xff] %v2172_v7  ;;  %3337 = vst [vmem:[#allocation132_spill] sm:$0xff] %v2177_v28  ;;  %v1096_v50 = vpop.eup %1095  ;;  %v2233_v33 = vmul.f32 %v2189_v1, %v2189_v1  ;;  %1115 = vlog2.f32 %v3288_v34  ;;  %v2237_v41 = vmul.f32 0.5, %v2151_v22  ;;  %v2241_v13 = vmul.f32 %v2202_v39, %v2202_v39 }
  0xa6   :  { %3338 = vst [vmem:[#allocation133_spill] sm:$0xff] %v2181_v10  ;;  %3339 = vst [vmem:[#allocation134_spill] sm:$0xff] %v2184_v46  ;;  %v1098_v8 = vpop.eup %1097  ;;  %1117 = vlog2.f32 %v3295_v30  ;;  %v2245_v45 = vmul.f32 0.5, %v2164_v24  ;;  %v2248_v37 = vmul.f32 0.003968254, %v2193_v60  ;;  %v2252_v34 = vmul.f32 0.5, %v2177_v28 }
  0xa7   :  { %3340 = vst [vmem:[#allocation135_spill] sm:$0xff] %v2189_v1  ;;  %3341 = vst [vmem:[#allocation136_spill] sm:$0xff] %v2197_v16  ;;  %v1100_v5 = vpop.eup %1099  ;;  %1119 = vlog2.f32 %v3302_v11  ;;  %v2255_v22 = vmul.f32 0.003968254, %v2206_v42  ;;  %v2258_v35 = vmul.f32 0.003968254, %v2210_v63 }
  0xa8   :  { %3342 = vst [vmem:[#allocation137_spill] sm:$0xff] %v2202_v39  ;;  %3343 = vst [vmem:[#allocation138_spill] sm:$0xff] %v2222_v17  ;;  %v1102_v4 = vpop.eup %1101  ;;  %1121 = vlog2.f32 %v3309_v0  ;;  %v2262_v24 = vmul.f32 0.5, %v2189_v1  ;;  %v2265_v30 = vmul.f32 0.5, %v2202_v39  ;;  %v2268_v11 = vmul.f32 0.003968254, %v2218_v3 }
  0xa9   :  { %3344 = vst [vmem:[#allocation139_spill] sm:$0xff] %v2237_v41  ;;  %v1104_v28 = vpop.eup %1103  ;;  %v2270_v31 = vmul.f32 0.6931472, %v1096_v50  ;;  %1123 = vlog2.f32 %v1755_v36  ;;  %v2274_v25 = vmul.f32 0.003968254, %v2229_v43 }
  0xaa   :  { %3345 = vst [vmem:[#allocation140_spill] sm:$0xff] %v2265_v30  ;;  %v2277_v19 = vmul.f32 0.003968254, %v2233_v33  ;;  %v1106_v0 = vpop.eup %1105  ;;  %v2279_v1 = vmul.f32 0.6931472, %v1098_v8  ;;  %1125 = vlog2.f32 %v1759_v26 }
  0xab   :  { %v2283_v39 = vmul.f32 0.003968254, %v2241_v13  ;;  %v438_v29 = vsub.f32 0.008333334, %v2123_v38  ;;  %v1108_v50 = vpop.eup %1107  ;;  %v2286_v44 = vmul.f32 0.6931472, %v1100_v5 }
  0xac   :  { %v2288_v36 = vmul.f32 0.6931472, %v1102_v4  ;;  %v439_v51 = vsub.f32 0.008333334, %v2136_v9  ;;  %v1110_v12 = vpop.eup %1109  ;;  %v2293_v8 = vmul.f32 0.6931472, %v1104_v28 }
  0xad   :  { %v440_v58 = vsub.f32 0.008333334, %v2149_v53  ;;  %v441_v38 = vsub.f32 0.008333334, %v2162_v55  ;;  %v1112_v30 = vpop.eup %1111  ;;  %v2299_v5 = vmul.f32 0.6931472, %v1106_v0 }
  0xae   :  { %v442_v9 = vsub.f32 0.008333334, %v2175_v18  ;;  %v1114_v28 = vpop.eup %1113  ;;  %v2306_v49 = vmul.f32 0.6931472, %v1108_v50  ;;  %v443_v53 = vsub.f32 0.008333334, %v2187_v6 }
  0xaf   :  { %v444_v55 = vsub.f32 0.008333334, %v2200_v56  ;;  %v1116_v0 = vpop.eup %1115  ;;  %v2312_v23 = vmul.f32 0.6931472, %v1110_v12  ;;  %v445_v21 = vsub.f32 0.008333334, %v2214_v61  ;;  %v457_v4 = vmul.f32 %v441_v38, %v2104_v14 }
  0xb0   :  { %v446_v18 = vsub.f32 0.008333334, %v2225_v59  ;;  %v1118_v20 = vpop.eup %1117  ;;  %v2318_v50 = vmul.f32 0.6931472, %v1112_v30  ;;  %v447_v6 = vsub.f32 0.008333334, %v2248_v37  ;;  %v459_v26 = vmul.f32 %v443_v53, %v2129_v40 }
  0xb1   :  { %v448_v56 = vsub.f32 0.008333334, %v2255_v22  ;;  %v1120_v2 = vpop.eup %1119  ;;  %v2324_v12 = vmul.f32 0.6931472, %v1114_v28  ;;  %v449_v61 = vsub.f32 0.008333334, %v2258_v35 }
  0xb2   :  { %v450_v59 = vsub.f32 0.008333334, %v2268_v11  ;;  %v1122_v62 = vpop.eup %1121  ;;  %v2330_v30 = vmul.f32 0.6931472, %v1116_v0  ;;  %v451_v37 = vsub.f32 0.008333334, %v2274_v25  ;;  %v454_v11 = vmul.f32 %v438_v29, %v2069_v27 }
  0xb3   :  { %v452_v22 = vsub.f32 0.008333334, %v2277_v19  ;;  %v1124_v7 = vpop.eup %1123  ;;  %v2336_v28 = vmul.f32 0.6931472, %v1118_v20  ;;  %v453_v35 = vsub.f32 0.008333334, %v2283_v39  ;;  %v455_v25 = vmul.f32 %v439_v51, %v2083_v15 }
  0xb4   :  { %3346 = vst [vmem:[#allocation141_spill] sm:$0xff] %v2330_v30  ;;  %v1126_v10 = vpop.eup %1125  ;;  %v2342_v0 = vmul.f32 0.6931472, %v1120_v2  ;;  %v456_v19 = vmul.f32 %v440_v58, %v2091_v32  ;;  %v2348_v46 = vmul.f32 0.6931472, %v1122_v62  ;;  %v458_v39 = vmul.f32 %v442_v9, %v2116_v54 }
  0xb5   :  { %3347 = vst [vmem:[#allocation142_spill] sm:$0xff] %v2336_v28  ;;  %v2354_v29 = vmul.f32 0.6931472, %v1124_v7  ;;  %v460_v51 = vmul.f32 %v444_v55, %v2142_v52  ;;  %v2360_v17 = vmul.f32 0.6931472, %v1126_v10  ;;  %v461_v62 = vmul.f32 %v445_v21, %v2155_v47 }
  0xb6   :  { %3348 = vst [vmem:[#allocation143_spill] sm:$0xff] %v2342_v0  ;;  %3349 = vst [vmem:[#allocation144_spill] sm:$0xff] %v2348_v46  ;;  %v418_v2 = vsub.f32 %v2342_v0, %v2245_v45  ;;  %v419_v58 = vsub.f32 %v2348_v46, %v2252_v34  ;;  %v462_v38 = vmul.f32 %v446_v18, %v2168_v48  ;;  %v470_v55 = vsub.f32 0.083333336, %v454_v11 }
  0xb7   :  { %v463_v9 = vmul.f32 %v447_v6, %v2193_v60  ;;  %v464_v7 = vmul.f32 %v448_v56, %v2206_v42  ;;  %v465_v20 = vmul.f32 %v449_v61, %v2210_v63  ;;  %v466_v45 = vmul.f32 %v450_v59, %v2218_v3  ;;  %v3350_v61 = vld [vmem:[#allocation140_spill] sm:$0xff] }
  0xb8   :  { %v467_v53 = vmul.f32 %v451_v37, %v2229_v43  ;;  %v468_v10 = vmul.f32 %v452_v22, %v2233_v33  ;;  %v471_v0 = vsub.f32 0.083333336, %v455_v25  ;;  %v469_v34 = vmul.f32 %v453_v35, %v2241_v13  ;;  %v3351_v35 = vld [vmem:[#allocation54_spill] sm:$0xff]  ;;  %v3408_v59 = vld [vmem:[#allocation20_spill] sm:$0xff] }
  0xb9   :  { %v472_v46 = vsub.f32 0.083333336, %v456_v19  ;;  %v473_v21 = vsub.f32 0.083333336, %v457_v4  ;;  %v474_v41 = vsub.f32 0.083333336, %v458_v39  ;;  %v420_v18 = vsub.f32 %v2354_v29, %v2262_v24 }
  0xba   :  { %v475_v6 = vsub.f32 0.083333336, %v459_v26  ;;  %v476_v56 = vsub.f32 0.083333336, %v460_v51  ;;  %v477_v28 = vsub.f32 0.083333336, %v461_v62  ;;  %v2379_v19 = vmul.f32 %v3351_v35, %v2270_v31 }
  0xbb   :  { %v478_v30 = vsub.f32 0.083333336, %v462_v38  ;;  %v479_v37 = vsub.f32 0.083333336, %v463_v9  ;;  %v480_v16 = vsub.f32 0.083333336, %v464_v7  ;;  %v486_v24 = vmul.f32 %v470_v55, %v2069_v27 }
  0xbc   :  { %v481_v22 = vsub.f32 0.083333336, %v465_v20  ;;  %v482_v11 = vsub.f32 0.083333336, %v466_v45  ;;  %v483_v25 = vsub.f32 0.083333336, %v467_v53  ;;  %v487_v26 = vmul.f32 %v471_v0, %v2083_v15 }
  0xbd   :  { %v484_v4 = vsub.f32 0.083333336, %v468_v10  ;;  %v485_v39 = vsub.f32 0.083333336, %v469_v34  ;;  %v488_v51 = vmul.f32 %v472_v46, %v2091_v32  ;;  %v489_v62 = vmul.f32 %v473_v21, %v2104_v14  ;;  %v3352_v21 = vld [vmem:[#allocation117_spill] sm:$0xff] }
  0xbe   :  { %v490_v38 = vmul.f32 %v474_v41, %v2116_v54  ;;  %v491_v20 = vmul.f32 %v475_v6, %v2129_v40  ;;  %v492_v9 = vmul.f32 %v476_v56, %v2142_v52  ;;  %v493_v7 = vmul.f32 %v477_v28, %v2155_v47 }
  0xbf   :  { %v494_v45 = vmul.f32 %v478_v30, %v2168_v48  ;;  %v495_v53 = vmul.f32 %v479_v37, %v2193_v60  ;;  %v496_v10 = vmul.f32 %v480_v16, %v2206_v42  ;;  %v497_v0 = vmul.f32 %v481_v22, %v2210_v63  ;;  %v3355_v30 = vld [vmem:[#allocation121_spill] sm:$0xff] }
  0xc0   :  { %v498_v46 = vmul.f32 %v482_v11, %v2218_v3  ;;  %v499_v55 = vmul.f32 %v483_v25, %v2229_v43  ;;  %v500_v41 = vmul.f32 %v484_v4, %v2233_v33  ;;  %v501_v34 = vmul.f32 %v485_v39, %v2241_v13  ;;  %v3360_v11 = vld [vmem:[#allocation125_spill] sm:$0xff]  ;;  %v3363_v4 = vld [vmem:[#allocation127_spill] sm:$0xff] }
  0xc1   :  { %v3353_v6 = vsub.f32 %v2270_v31, %v3352_v21  ;;  %v3356_v56 = vsub.f32 %v2279_v1, %v3355_v30  ;;  %v3358_v16 = vsub.f32 %v2286_v44, %v2120_v57  ;;  %v3361_v25 = vsub.f32 %v2288_v36, %v3360_v11  ;;  %v3372_v30 = vld [vmem:[#allocation133_spill] sm:$0xff] }
  0xc2   :  { %v3364_v31 = vsub.f32 %v2293_v8, %v3363_v4 }
  0xc3   :  { %v2400_v28 = vsub.f32 %v3353_v6, %v486_v24  ;;  %v2405_v37 = vsub.f32 %v3356_v56, %v487_v26  ;;  %v2410_v22 = vsub.f32 %v3358_v16, %v488_v51  ;;  %v2415_v35 = vsub.f32 %v3361_v25, %v489_v62  ;;  %v3366_v24 = vld [vmem:[#allocation129_spill] sm:$0xff]  ;;  %v3369_v6 = vld [vmem:[#allocation131_spill] sm:$0xff]  ;;  %v3375_v16 = vld [vmem:[#allocation134_spill] sm:$0xff] }
  0xc4   :  { %v2420_v39 = vsub.f32 %v3364_v31, %v490_v38  ;;  %v3367_v21 = vsub.f32 %v2299_v5, %v3366_v24  ;;  %v3370_v57 = vsub.f32 %v2306_v49, %v3369_v6  ;;  %v3373_v56 = vsub.f32 %v2312_v23, %v3372_v30  ;;  %v3378_v25 = vld [vmem:[#allocation136_spill] sm:$0xff]  ;;  %v3381_v31 = vld [vmem:[#allocation141_spill] sm:$0xff]  ;;  %v3382_v24 = vld [vmem:[#allocation138_spill] sm:$0xff] }
  0xc5   :  { %3354 = vst [vmem:[#allocation140_spill] sm:$0xff] %v2400_v28  ;;  %3357 = vst [vmem:[#allocation54_spill] sm:$0xff] %v2405_v37  ;;  %v3376_v11 = vsub.f32 %v2318_v50, %v3375_v16  ;;  %v3379_v4 = vsub.f32 %v2324_v12, %v3378_v25  ;;  %v3385_v6 = vld [vmem:[#allocation142_spill] sm:$0xff]  ;;  %v2459_v16 = vsub.f32 %v419_v58, %v499_v55  ;;  %v3393_v25 = vld [vmem:[#allocation43_spill] sm:$0xff] }
  0xc6   :  { %3359 = vst [vmem:[#allocation117_spill] sm:$0xff] %v2410_v22  ;;  %3362 = vst [vmem:[#allocation121_spill] sm:$0xff] %v2415_v35  ;;  %v2425_v26 = vsub.f32 %v3367_v21, %v491_v20  ;;  %v2430_v51 = vsub.f32 %v3370_v57, %v492_v9  ;;  %v2435_v62 = vsub.f32 %v3373_v56, %v493_v7  ;;  %v3386_v57 = vld [vmem:[#allocation139_spill] sm:$0xff]  ;;  %v3397_v58 = vld [vmem:[#allocation45_spill] sm:$0xff] }
  0xc7   :  { %3365 = vst [vmem:[#allocation125_spill] sm:$0xff] %v2420_v39  ;;  %v2440_v38 = vsub.f32 %v3376_v11, %v494_v45  ;;  %v2445_v20 = vsub.f32 %v3379_v4, %v495_v53  ;;  %v3383_v21 = vsub.f32 %v3381_v31, %v3382_v24  ;;  %v3387_v30 = vsub.f32 %v3385_v6, %v3386_v57  ;;  %v3392_v11 = vld [vmem:[#allocation55_spill] sm:$0xff]  ;;  %v3441_v35 = vld [vmem:[#allocation76_spill] sm:$0xff] }
  0xc8   :  { %3368 = vst [vmem:[#allocation127_spill] sm:$0xff] %v2425_v26  ;;  %3371 = vst [vmem:[#allocation129_spill] sm:$0xff] %v2430_v51  ;;  %v2457_v56 = vsub.f32 %v418_v2, %v498_v46  ;;  %v2461_v45 = vsub.f32 %v420_v18, %v500_v41  ;;  %v535_v53 = vmul.f32 %v3392_v11, %v2279_v1  ;;  %v3398_v18 = vld [vmem:[#allocation58_spill] sm:$0xff] }
  0xc9   :  { %3374 = vst [vmem:[#allocation131_spill] sm:$0xff] %v2435_v62  ;;  %3377 = vst [vmem:[#allocation133_spill] sm:$0xff] %v2440_v38  ;;  %v2450_v9 = vsub.f32 %v3383_v21, %v496_v10  ;;  %v2455_v7 = vsub.f32 %v3387_v30, %v497_v0  ;;  %v536_v4 = vmul.f32 %v3393_v25, %v2286_v44  ;;  %v3394_v10 = vld [vmem:[#allocation56_spill] sm:$0xff]  ;;  %v3396_v0 = vld [vmem:[#allocation57_spill] sm:$0xff] }
  0xca   :  { %3380 = vst [vmem:[#allocation134_spill] sm:$0xff] %v2445_v20  ;;  %3389 = vst [vmem:[#allocation138_spill] sm:$0xff] %v2457_v56  ;;  %v537_v24 = vmul.f32 %v3394_v10, %v2288_v36  ;;  %v3395_v21 = vld [vmem:[#allocation44_spill] sm:$0xff]  ;;  %v539_v2 = vmul.f32 %v3396_v0, %v2299_v5  ;;  %v540_v46 = vmul.f32 %v3397_v58, %v2306_v49  ;;  %v3399_v1 = vld [vmem:[#allocation46_spill] sm:$0xff] }
  0xcb   :  { %3384 = vst [vmem:[#allocation136_spill] sm:$0xff] %v2450_v9  ;;  %3388 = vst [vmem:[#allocation141_spill] sm:$0xff] %v2455_v7  ;;  %v538_v57 = vmul.f32 %v3395_v21, %v2293_v8  ;;  %v541_v55 = vmul.f32 %v3398_v18, %v2312_v23  ;;  %v542_v41 = vmul.f32 %v3399_v1, %v2318_v50  ;;  %v3400_v44 = vld [vmem:[#allocation59_spill] sm:$0xff]  ;;  %v3402_v8 = vld [vmem:[#allocation60_spill] sm:$0xff] }
  0xcc   :  { %3390 = vst [vmem:[#allocation142_spill] sm:$0xff] %v2459_v16  ;;  %3391 = vst [vmem:[#allocation139_spill] sm:$0xff] %v2461_v45  ;;  %v543_v30 = vmul.f32 %v3400_v44, %v2324_v12  ;;  %v3401_v36 = vld [vmem:[#allocation47_spill] sm:$0xff]  ;;  %v545_v25 = vmul.f32 %v3402_v8, %v3385_v6  ;;  %v3404_v5 = vld [vmem:[#allocation48_spill] sm:$0xff]  ;;  %v550_v50 = vsub.f32 %v2379_v19, %v3408_v59 }
  0xcd   :  { %v544_v11 = vmul.f32 %v3401_v36, %v3381_v31  ;;  %v3403_v10 = vld [vmem:[#allocation143_spill] sm:$0xff]  ;;  %v3405_v0 = vld [vmem:[#allocation144_spill] sm:$0xff]  ;;  %v3406_v49 = vld [vmem:[#allocation61_spill] sm:$0xff] }
  0xce   :  { %v546_v21 = vmul.f32 %v3404_v5, %v3403_v10  ;;  %v547_v58 = vmul.f32 %v3406_v49, %v3405_v0  ;;  %v3407_v23 = vld [vmem:[#allocation49_spill] sm:$0xff]  ;;  %v3409_v12 = vld [vmem:[#allocation62_spill] sm:$0xff]  ;;  %v3411_v36 = vld [vmem:[#allocation23_spill] sm:$0xff] }
  0xcf   :  { %v548_v18 = vmul.f32 %v3407_v23, %v2354_v29  ;;  %v549_v1 = vmul.f32 %v3409_v12, %v2360_v17  ;;  %v3410_v44 = vld [vmem:[#allocation22_spill] sm:$0xff]  ;;  %v552_v45 = vsub.f32 %v536_v4, %v3411_v36  ;;  %v3413_v16 = vld [vmem:[#allocation27_spill] sm:$0xff]  ;;  %v3414_v5 = vld [vmem:[#allocation28_spill] sm:$0xff] }
  0xd0   :  { %v551_v31 = vsub.f32 %v535_v53, %v3410_v44  ;;  %v3412_v6 = vld [vmem:[#allocation26_spill] sm:$0xff]  ;;  %v554_v10 = vsub.f32 %v538_v57, %v3413_v16  ;;  %v555_v56 = vsub.f32 %v539_v2, %v3414_v5  ;;  %v3415_v0 = vld [vmem:[#allocation31_spill] sm:$0xff]  ;;  %v3416_v7 = vld [vmem:[#allocation32_spill] sm:$0xff]  ;;  %v2509_v57 = vadd.f32 0.9189385, %v550_v50 }
  0xd1   :  { %v553_v8 = vsub.f32 %v537_v24, %v3412_v6  ;;  %v556_v49 = vsub.f32 %v540_v46, %v3415_v0  ;;  %v557_v29 = vsub.f32 %v541_v55, %v3416_v7  ;;  %v3417_v23 = vld [vmem:[#allocation33_spill] sm:$0xff]  ;;  %v3418_v59 = vld [vmem:[#allocation34_spill] sm:$0xff]  ;;  %v3421_v44 = vld [vmem:[#allocation39_spill] sm:$0xff]  ;;  %v2514_v7 = vadd.f32 0.9189385, %v552_v45 }
  0xd2   :  { %v558_v9 = vsub.f32 %v542_v41, %v3417_v23  ;;  %v559_v19 = vsub.f32 %v543_v30, %v3418_v59  ;;  %v3419_v20 = vld [vmem:[#allocation37_spill] sm:$0xff]  ;;  %v3420_v38 = vld [vmem:[#allocation38_spill] sm:$0xff]  ;;  %v562_v4 = vsub.f32 %v546_v21, %v3421_v44  ;;  %v2512_v5 = vadd.f32 0.9189385, %v551_v31 }
  0xd3   :  { %v560_v12 = vsub.f32 %v544_v11, %v3419_v20  ;;  %v561_v53 = vsub.f32 %v545_v25, %v3420_v38  ;;  %v3422_v36 = vld [vmem:[#allocation41_spill] sm:$0xff]  ;;  %v3423_v6 = vld [vmem:[#allocation42_spill] sm:$0xff]  ;;  %v2516_v55 = vadd.f32 0.9189385, %v553_v8  ;;  %v3425_v20 = vsub.f32 %v2360_v17, %v3350_v61 }
  0xd4   :  { %v563_v24 = vsub.f32 %v547_v58, %v3422_v36  ;;  %v564_v16 = vsub.f32 %v548_v18, %v3423_v6  ;;  %v3424_v2 = vld [vmem:[#allocation53_spill] sm:$0xff]  ;;  %v2523_v41 = vadd.f32 0.9189385, %v554_v10  ;;  %v2525_v30 = vadd.f32 0.9189385, %v555_v56  ;;  %v3444_v10 = vld [vmem:[#allocation134_spill] sm:$0xff] }
  0xd5   :  { %v565_v46 = vsub.f32 %v549_v1, %v3424_v2  ;;  %v2521_v38 = vsub.f32 %v3425_v20, %v501_v34  ;;  %v2527_v11 = vadd.f32 0.9189385, %v556_v49  ;;  %v2529_v25 = vadd.f32 0.9189385, %v557_v29  ;;  %v3442_v8 = vld [vmem:[#allocation133_spill] sm:$0xff] }
  0xd6   :  { %v2531_v21 = vadd.f32 0.9189385, %v558_v9  ;;  %v2533_v58 = vadd.f32 0.9189385, %v559_v19  ;;  %v2537_v50 = vadd.f32 0.9189385, %v560_v12 }
  0xd7   :  { %3426 = vst [vmem:[#allocation55_spill] sm:$0xff] %v2521_v38  ;;  %v2539_v17 = vadd.f32 0.9189385, %v561_v53  ;;  %v2541_v61 = vadd.f32 0.9189385, %v562_v4  ;;  %v3443_v56 = vld [vmem:[#allocation77_spill] sm:$0xff] }
  0xd8   :  { %3428 = vst [vmem:[#allocation43_spill] sm:$0xff] %v2537_v50  ;;  %v2545_v1 = vadd.f32 0.9189385, %v563_v24  ;;  %v2547_v31 = vadd.f32 0.9189385, %v564_v16 }
  0xd9   :  { %3429 = vst [vmem:[#allocation56_spill] sm:$0xff] %v2539_v17  ;;  %3430 = vst [vmem:[#allocation44_spill] sm:$0xff] %v2541_v61  ;;  %v2549_v9 = vadd.f32 0.9189385, %v565_v46  ;;  %v582_v0 = vmul.f32 0.0007936508, %v2069_v27 }
  0xda   :  { %3432 = vst [vmem:[#allocation57_spill] sm:$0xff] %v2545_v1  ;;  %3433 = vst [vmem:[#allocation45_spill] sm:$0xff] %v2547_v31  ;;  %v583_v49 = vmul.f32 0.0007936508, %v2083_v15  ;;  %v584_v29 = vmul.f32 0.0007936508, %v2091_v32 }
  0xdb   :  { %3434 = vst [vmem:[#allocation58_spill] sm:$0xff] %v2549_v9  ;;  %v585_v19 = vmul.f32 0.0007936508, %v2104_v14  ;;  %v586_v12 = vmul.f32 0.0007936508, %v2116_v54  ;;  %v3445_v31 = vld [vmem:[#allocation78_spill] sm:$0xff] }
  0xdc   :  { %v587_v53 = vmul.f32 0.0007936508, %v2129_v40  ;;  %v588_v36 = vmul.f32 0.0007936508, %v2142_v52  ;;  %v589_v24 = vmul.f32 0.0007936508, %v2155_v47 }
  0xdd   :  { %v590_v6 = vmul.f32 0.0007936508, %v2168_v48  ;;  %v591_v46 = vmul.f32 0.0007936508, %v2193_v60  ;;  %v592_v20 = vmul.f32 0.0007936508, %v2206_v42 }
  0xde   :  { %v593_v59 = vmul.f32 0.0007936508, %v2210_v63  ;;  %v594_v4 = vmul.f32 0.0007936508, %v2218_v3  ;;  %v595_v18 = vmul.f32 0.0007936508, %v2229_v43 }
  0xdf   :  { %v596_v44 = vmul.f32 0.0007936508, %v2233_v33  ;;  %v597_v2 = vmul.f32 0.0007936508, %v2241_v13  ;;  %v598_v16 = vsub.f32 0.0027777778, %v582_v0 }
  0xe0   :  { %v599_v26 = vsub.f32 0.0027777778, %v583_v49  ;;  %v600_v34 = vsub.f32 0.0027777778, %v584_v29  ;;  %v601_v37 = vsub.f32 0.0027777778, %v585_v19 }
  0xe1   :  { %v602_v45 = vsub.f32 0.0027777778, %v586_v12  ;;  %v603_v28 = vsub.f32 0.0027777778, %v587_v53  ;;  %v604_v38 = vsub.f32 0.0027777778, %v588_v36  ;;  %v614_v19 = vmul.f32 %v598_v16, %v2069_v27 }
  0xe2   :  { %v605_v9 = vsub.f32 0.0027777778, %v589_v24  ;;  %v3446_v1 = vld [vmem:[#allocation136_spill] sm:$0xff]  ;;  %v606_v23 = vsub.f32 0.0027777778, %v590_v6  ;;  %v3447_v0 = vld [vmem:[#allocation79_spill] sm:$0xff]  ;;  %v615_v51 = vmul.f32 %v599_v26, %v2083_v15  ;;  %v616_v53 = vmul.f32 %v600_v34, %v2091_v32 }
  0xe3   :  { %v607_v39 = vsub.f32 0.0027777778, %v591_v46  ;;  %v608_v62 = vsub.f32 0.0027777778, %v592_v20  ;;  %v3448_v49 = vld [vmem:[#allocation141_spill] sm:$0xff]  ;;  %v617_v36 = vmul.f32 %v601_v37, %v2104_v14  ;;  %v618_v6 = vmul.f32 %v602_v45, %v2116_v54 }
  0xe4   :  { %v609_v50 = vsub.f32 0.0027777778, %v593_v59  ;;  %v610_v22 = vsub.f32 0.0027777778, %v594_v4  ;;  %v611_v29 = vsub.f32 0.0027777778, %v595_v18  ;;  %v619_v46 = vmul.f32 %v603_v28, %v2129_v40 }
  0xe5   :  { %v612_v12 = vsub.f32 0.0027777778, %v596_v44  ;;  %v613_v24 = vsub.f32 0.0027777778, %v597_v2  ;;  %v620_v20 = vmul.f32 %v604_v38, %v2142_v52  ;;  %v621_v59 = vmul.f32 %v605_v9, %v2155_v47  ;;  %v3452_v9 = vld [vmem:[#allocation105_spill] sm:$0xff]  ;;  %v3453_v4 = vld [vmem:[#allocation107_spill] sm:$0xff] }
  0xe6   :  { %v622_v18 = vmul.f32 %v606_v23, %v2168_v48  ;;  %v623_v27 = vmul.f32 %v607_v39, %v2193_v60  ;;  %v624_v44 = vmul.f32 %v608_v62, %v2206_v42  ;;  %v625_v15 = vmul.f32 %v609_v50, %v2210_v63  ;;  %v3449_v62 = vld [vmem:[#allocation80_spill] sm:$0xff]  ;;  %v3450_v63 = vld [vmem:[#allocation138_spill] sm:$0xff]  ;;  %v3454_v2 = vld [vmem:[#allocation109_spill] sm:$0xff] }
  0xe7   :  { %v626_v32 = vmul.f32 %v610_v22, %v2218_v3  ;;  %v627_v14 = vmul.f32 %v611_v29, %v2229_v43  ;;  %v630_v37 = vsub.f32 0.083333336, %v614_v19  ;;  %v628_v54 = vmul.f32 %v612_v12, %v2233_v33  ;;  %v3451_v50 = vld [vmem:[#allocation16_spill] sm:$0xff]  ;;  %v3455_v19 = vld [vmem:[#allocation111_spill] sm:$0xff] }
  0xe8   :  { %v631_v40 = vsub.f32 0.083333336, %v615_v51  ;;  %v632_v28 = vsub.f32 0.083333336, %v616_v53  ;;  %v633_v52 = vsub.f32 0.083333336, %v617_v36  ;;  %v629_v47 = vmul.f32 %v613_v24, %v2241_v13 }
  0xe9   :  { %v634_v26 = vsub.f32 0.083333336, %v618_v6  ;;  %v635_v48 = vsub.f32 0.083333336, %v619_v46  ;;  %v636_v38 = vsub.f32 0.083333336, %v620_v20  ;;  %v646_v34 = vmul.f32 %v3451_v50, %v630_v37 }
  0xea   :  { %v637_v60 = vsub.f32 0.083333336, %v621_v59  ;;  %v638_v39 = vsub.f32 0.083333336, %v622_v18  ;;  %v639_v42 = vsub.f32 0.083333336, %v623_v27  ;;  %v647_v23 = vmul.f32 %v3452_v9, %v631_v40 }
  0xeb   :  { %v640_v3 = vsub.f32 0.083333336, %v624_v44  ;;  %v641_v22 = vsub.f32 0.083333336, %v625_v15  ;;  %v642_v43 = vsub.f32 0.083333336, %v626_v32  ;;  %v648_v13 = vmul.f32 %v3453_v4, %v632_v28 }
  0xec   :  { %v643_v33 = vsub.f32 0.083333336, %v627_v14  ;;  %v644_v51 = vsub.f32 0.083333336, %v628_v54  ;;  %v645_v16 = vsub.f32 0.083333336, %v629_v47  ;;  %v649_v29 = vmul.f32 %v3454_v2, %v633_v52 }
  0xed   :  { %v650_v12 = vmul.f32 %v3455_v19, %v634_v26  ;;  %v3456_v53 = vld [vmem:[#allocation113_spill] sm:$0xff]  ;;  %v3457_v24 = vld [vmem:[#allocation116_spill] sm:$0xff]  ;;  %v3459_v59 = vld [vmem:[#allocation123_spill] sm:$0xff] }
  0xee   :  { %v651_v36 = vmul.f32 %v3456_v53, %v635_v48  ;;  %v652_v6 = vmul.f32 %v3457_v24, %v636_v38  ;;  %v3458_v46 = vld [vmem:[#allocation120_spill] sm:$0xff]  ;;  %v654_v18 = vmul.f32 %v3459_v59, %v638_v39  ;;  %v3461_v15 = vld [vmem:[#allocation126_spill] sm:$0xff]  ;;  %v3466_v26 = vld [vmem:[#allocation135_spill] sm:$0xff]  ;;  %v662_v38 = vadd.f32 %v646_v34, %v2509_v57 }
  0xef   :  { %v653_v20 = vmul.f32 %v3458_v46, %v637_v60  ;;  %v3460_v27 = vld [vmem:[#allocation124_spill] sm:$0xff]  ;;  %v656_v32 = vmul.f32 %v3461_v15, %v640_v3  ;;  %v3463_v54 = vld [vmem:[#allocation130_spill] sm:$0xff]  ;;  %v660_v48 = vmul.f32 %v3466_v26, %v644_v51  ;;  %v663_v60 = vadd.f32 %v647_v23, %v2512_v5  ;;  %v3467_v50 = vld [vmem:[#allocation137_spill] sm:$0xff] }
  0xf0   :  { %v655_v44 = vmul.f32 %v3460_v27, %v639_v42  ;;  %v3462_v14 = vld [vmem:[#allocation128_spill] sm:$0xff]  ;;  %v658_v40 = vmul.f32 %v3463_v54, %v642_v43  ;;  %v661_v39 = vmul.f32 %v3467_v50, %v645_v16  ;;  %v664_v42 = vadd.f32 %v648_v13, %v2514_v7  ;;  %v3468_v34 = vld [vmem:[#allocation43_spill] sm:$0xff]  ;;  %v3473_v13 = vld [vmem:[#allocation50_spill] sm:$0xff] }
  0xf1   :  { %v657_v37 = vmul.f32 %v3462_v14, %v641_v22  ;;  %v3464_v28 = vld [vmem:[#allocation68_spill] sm:$0xff]  ;;  %v665_v3 = vadd.f32 %v649_v29, %v2516_v55  ;;  %v666_v22 = vadd.f32 %v650_v12, %v2523_v41  ;;  %v667_v43 = vadd.f32 %v651_v36, %v2525_v30  ;;  %v3475_v2 = vld [vmem:[#allocation51_spill] sm:$0xff]  ;;  %v3477_v19 = vld [vmem:[#allocation57_spill] sm:$0xff] }
  0xf2   :  { %1127 = vrcp.f32 %v3464_v28  ;;  %v3465_v52 = vld [vmem:[#allocation132_spill] sm:$0xff]  ;;  %v2629_v9 = vadd.f32 %v652_v6, %v2527_v11  ;;  %v2635_v57 = vadd.f32 %v654_v18, %v2531_v21  ;;  %v2638_v5 = vadd.f32 %v655_v44, %v2533_v58  ;;  %v3476_v29 = vld [vmem:[#allocation115_spill] sm:$0xff]  ;;  %v3478_v53 = vld [vmem:[#allocation45_spill] sm:$0xff] }
  0xf3   :  { %v659_v47 = vmul.f32 %v3465_v52, %v643_v33  ;;  %v2632_v33 = vadd.f32 %v653_v20, %v2529_v25  ;;  %v2641_v7 = vadd.f32 %v656_v32, %v3468_v34  ;;  %v3469_v55 = vmov %v2539_v17  ;;  %v3471_v11 = vld [vmem:[#allocation40_spill] sm:$0xff]  ;;  %v3479_v24 = vld [vmem:[#allocation58_spill] sm:$0xff]  ;;  %v3480_v46 = vld [vmem:[#allocation81_spill] sm:$0xff] }
  0xf4   :  { %v2644_v51 = vadd.f32 %v657_v37, %v3469_v55  ;;  %v3470_v41 = vmov %v2541_v61  ;;  %v694_v23 = vsub.f32 %v662_v38, %v3471_v11  ;;  %v3472_v4 = vld [vmem:[#allocation84_spill] sm:$0xff]  ;;  %v831_v58 = vsub.f32 %v3476_v29, %v3475_v2  ;;  %v3481_v20 = vld [vmem:[#allocation142_spill] sm:$0xff]  ;;  %v3483_v27 = vld [vmem:[#allocation139_spill] sm:$0xff] }
  0xf5   :  { %v2647_v30 = vadd.f32 %v658_v40, %v3470_v41  ;;  %v695_v25 = vsub.f32 %v663_v60, %v3472_v4  ;;  %v3474_v16 = vld [vmem:[#allocation112_spill] sm:$0xff]  ;;  %v2656_v12 = vadd.f32 %v659_v47, %v3477_v19  ;;  %v2659_v36 = vadd.f32 %v660_v48, %v3478_v53  ;;  %v3482_v18 = vld [vmem:[#allocation82_spill] sm:$0xff]  ;;  %v3485_v14 = vld [vmem:[#allocation83_spill] sm:$0xff] }
  0xf6   :  { %v830_v21 = vsub.f32 %v3474_v16, %v3473_v13  ;;  %v2662_v6 = vadd.f32 %v661_v39, %v3479_v24  ;;  %v3484_v15 = vld [vmem:[#allocation86_spill] sm:$0xff]  ;;  %1129 = vlog2.f32 %v3464_v28  ;;  %v3487_v40 = vld [vmem:[#allocation67_spill] sm:$0xff]  ;;  %v3489_v26 = vld [vmem:[#allocation89_spill] sm:$0xff]  ;;  %v862_v29 = vmul.f32 0.001, %v694_v23 }
  0xf7   :  { %v696_v32 = vsub.f32 %v664_v42, %v3484_v15  ;;  %v3486_v37 = vld [vmem:[#allocation118_spill] sm:$0xff]  ;;  %v3488_v52 = vld [vmem:[#allocation55_spill] sm:$0xff]  ;;  %v697_v48 = vsub.f32 %v665_v3, %v3489_v26  ;;  %v3493_v55 = vld [vmem:[#allocation140_spill] sm:$0xff]  ;;  %v863_v19 = vmul.f32 0.001, %v695_v25 }
  0xf8   :  { %v832_v54 = vsub.f32 %v3486_v37, %v3485_v14  ;;  %v3490_v38 = vld [vmem:[#allocation14_spill] sm:$0xff]  ;;  %v3491_v50 = vld [vmem:[#allocation11_spill] sm:$0xff]  ;;  %v3497_v13 = vld [vmem:[#allocation64_spill] sm:$0xff] }
  0xf9   :  { %v819_v60 = vmul.f32 0.001, %v3490_v38  ;;  %v3492_v39 = vld [vmem:[#allocation119_spill] sm:$0xff]  ;;  %v3496_v42 = vld [vmem:[#allocation54_spill] sm:$0xff]  ;;  %v3499_v24 = vld [vmem:[#allocation93_spill] sm:$0xff] }
  0xfa   :  { %v833_v34 = vsub.f32 %v3492_v39, %v3491_v50  ;;  %v3494_v41 = vld [vmem:[#allocation63_spill] sm:$0xff]  ;;  %v3498_v16 = vsub.f32 %v3496_v42, %v3497_v13  ;;  %v698_v15 = vsub.f32 %v666_v22, %v3499_v24  ;;  %v3500_v3 = vld [vmem:[#allocation96_spill] sm:$0xff]  ;;  %v3503_v39 = vld [vmem:[#allocation102_spill] sm:$0xff]  ;;  %v864_v13 = vmul.f32 0.001, %v696_v32 }
  0xfb   :  { %v3495_v11 = vsub.f32 %v3493_v55, %v3494_v41  ;;  %v699_v14 = vsub.f32 %v667_v43, %v3500_v3  ;;  %v3501_v37 = vld [vmem:[#allocation99_spill] sm:$0xff]  ;;  %v3504_v55 = vld [vmem:[#allocation85_spill] sm:$0xff]  ;;  %v3505_v41 = vld [vmem:[#allocation122_spill] sm:$0xff] }
  0xfc   :  { %v847_v2 = vmul.f32 %v831_v58, %v3498_v16  ;;  %v2684_v53 = vpop.eup %1127  ;;  %v700_v26 = vsub.f32 %v2629_v9, %v3501_v37  ;;  %v3502_v38 = vld [vmem:[#allocation15_spill] sm:$0xff]  ;;  %v3506_v58 = vld [vmem:[#allocation117_spill] sm:$0xff]  ;;  %v3509_v16 = vld [vmem:[#allocation104_spill] sm:$0xff] }
  0xfd   :  { %v846_v4 = vmul.f32 %v830_v21, %v3495_v11  ;;  %v820_v50 = vmul.f32 0.001, %v3502_v38  ;;  %v701_v21 = vsub.f32 %v2632_v33, %v3503_v39  ;;  %v834_v11 = vsub.f32 %v3505_v41, %v3504_v55  ;;  %v3507_v23 = vld [vmem:[#allocation65_spill] sm:$0xff]  ;;  %v3510_v43 = vld [vmem:[#allocation18_spill] sm:$0xff]  ;;  %v3511_v3 = vld [vmem:[#allocation87_spill] sm:$0xff] }
  0xfe   :  { %v3508_v25 = vsub.f32 %v3506_v58, %v3507_v23  ;;  %v702_v22 = vsub.f32 %v2635_v57, %v3509_v16  ;;  %v821_v24 = vmul.f32 0.001, %v3510_v43  ;;  %v835_v9 = vsub.f32 %v819_v60, %v3511_v3  ;;  %v3512_v37 = vld [vmem:[#allocation121_spill] sm:$0xff]  ;;  %v3513_v38 = vld [vmem:[#allocation66_spill] sm:$0xff]  ;;  %v3517_v23 = vld [vmem:[#allocation19_spill] sm:$0xff] }
  0xff   :  { %v3514_v47 = vsub.f32 %v3512_v37, %v3513_v38  ;;  %v2707_v33 = vmul.f32 %v2684_v53, %v2684_v53  ;;  %v865_v39 = vmul.f32 0.001, %v697_v48  ;;  %v878_v55 = vsub.f32 %v846_v4, %v862_v29  ;;  %v3516_v58 = vld [vmem:[#allocation13_spill] sm:$0xff]  ;;  %v3518_v60 = vld [vmem:[#allocation88_spill] sm:$0xff] }
 0x100   :  { %v848_v42 = vmul.f32 %v832_v54, %v3508_v25  ;;  %v879_v41 = vsub.f32 %v847_v2, %v863_v19  ;;  %v3515_v54 = vld [vmem:[#allocation12_spill] sm:$0xff]  ;;  %v704_v57 = vsub.f32 %v2641_v7, %v3516_v58  ;;  %v822_v25 = vmul.f32 0.001, %v3517_v23  ;;  %v3519_v43 = vld [vmem:[#allocation17_spill] sm:$0xff]  ;;  %v3523_v2 = vld [vmem:[#allocation106_spill] sm:$0xff] }
 0x101   :  { %v849_v44 = vmul.f32 %v833_v34, %v3514_v47  ;;  %v703_v32 = vsub.f32 %v2638_v5, %v3515_v54  ;;  %v836_v16 = vsub.f32 %v820_v50, %v3518_v60  ;;  %v705_v47 = vsub.f32 %v2644_v51, %v3519_v43  ;;  %v3520_v34 = vld [vmem:[#allocation125_spill] sm:$0xff]  ;;  %v3525_v54 = vld [vmem:[#allocation90_spill] sm:$0xff]  ;;  %v3526_v58 = vld [vmem:[#allocation127_spill] sm:$0xff]  ;;  %v1130_v60 = vpop.eup %1129 }
 0x102   :  { %v3521_v3 = vld [vmem:[#allocation69_spill] sm:$0xff]  ;;  %v866_v48 = vmul.f32 0.001, %v698_v15  ;;  %v880_v4 = vsub.f32 %v848_v42, %v864_v13  ;;  %v706_v29 = vsub.f32 %v2647_v30, %v3523_v2  ;;  %v837_v7 = vsub.f32 %v821_v24, %v3525_v54  ;;  %v3527_v23 = vld [vmem:[#allocation72_spill] sm:$0xff]  ;;  %v3531_v13 = vld [vmem:[#allocation91_spill] sm:$0xff] }
 0x103   :  { %v3522_v37 = vsub.f32 %v3520_v34, %v3521_v3  ;;  %v3524_v5 = vld [vmem:[#allocation21_spill] sm:$0xff]  ;;  %v3528_v59 = vsub.f32 %v3526_v58, %v3527_v23  ;;  %v742_v51 = vmul.f32 0.0007936508, %v2707_v33  ;;  %v867_v43 = vmul.f32 0.001, %v699_v14  ;;  %v3530_v15 = vld [vmem:[#allocation24_spill] sm:$0xff] }
 0x104   :  { %v823_v19 = vmul.f32 0.001, %v3524_v5  ;;  %v881_v45 = vsub.f32 %v849_v44, %v865_v39  ;;  %v894_v34 = vadd.f32 %v879_v41, %v878_v55  ;;  %v824_v42 = vmul.f32 0.001, %v3530_v15  ;;  %v3532_v3 = vld [vmem:[#allocation129_spill] sm:$0xff]  ;;  %v3536_v39 = vld [vmem:[#allocation94_spill] sm:$0xff] }
 0x105   :  { %v850_v38 = vmul.f32 %v834_v11, %v3522_v37  ;;  %v851_v50 = vmul.f32 %v835_v9, %v3528_v59  ;;  %v3529_v11 = vld [vmem:[#allocation70_spill] sm:$0xff]  ;;  %v838_v30 = vsub.f32 %v822_v25, %v3531_v13  ;;  %v732_v5 = vmul.f32 0.003968254, %v2707_v33  ;;  %v3535_v14 = vld [vmem:[#allocation25_spill] sm:$0xff]  ;;  %v3537_v41 = vld [vmem:[#allocation131_spill] sm:$0xff] }
 0x106   :  { %1131 = vrcp.f32 %v3529_v11  ;;  %v3533_v37 = vld [vmem:[#allocation74_spill] sm:$0xff]  ;;  %v868_v54 = vmul.f32 0.001, %v700_v26  ;;  %v895_v9 = vadd.f32 %v894_v34, %v880_v4  ;;  %v2735_v58 = vmul.f32 0.6931472, %v1130_v60  ;;  %v3538_v23 = vld [vmem:[#allocation75_spill] sm:$0xff] }
 0x107   :  { %v3534_v2 = vsub.f32 %v3532_v3, %v3533_v37  ;;  %v882_v59 = vsub.f32 %v850_v38, %v866_v48  ;;  %v825_v44 = vmul.f32 0.001, %v3535_v14  ;;  %v839_v55 = vsub.f32 %v823_v19, %v3536_v39  ;;  %v3541_v38 = vld [vmem:[#allocation95_spill] sm:$0xff] }
 0x108   :  { %v3539_v15 = vsub.f32 %v3537_v41, %v3538_v23  ;;  %v743_v25 = vsub.f32 0.0027777778, %v742_v51  ;;  %v869_v13 = vmul.f32 0.001, %v701_v21  ;;  %v883_v61 = vsub.f32 %v851_v50, %v867_v43  ;;  %v3544_v21 = vld [vmem:[#allocation30_spill] sm:$0xff] }
 0x109   :  { %v852_v24 = vmul.f32 %v836_v16, %v3534_v2  ;;  %v896_v3 = vadd.f32 %v895_v9, %v881_v45  ;;  %1133 = vlog2.f32 %v3529_v11  ;;  %v3540_v16 = vld [vmem:[#allocation29_spill] sm:$0xff]  ;;  %v840_v48 = vsub.f32 %v824_v42, %v3541_v38 }
 0x10a   :  { %v853_v17 = vmul.f32 %v837_v7, %v3539_v15  ;;  %v826_v26 = vmul.f32 0.001, %v3540_v16  ;;  %v3542_v4 = vsub.f32 %v3442_v8, %v3441_v35  ;;  %v733_v34 = vsub.f32 0.008333334, %v732_v5  ;;  %v3543_v7 = vld [vmem:[#allocation52_spill] sm:$0xff]  ;;  %v3545_v45 = vld [vmem:[#allocation97_spill] sm:$0xff] }
 0x10b   :  { %v870_v19 = vmul.f32 0.001, %v702_v22  ;;  %v884_v37 = vsub.f32 %v852_v24, %v868_v54  ;;  %v897_v2 = vadd.f32 %v896_v3, %v882_v59  ;;  %v739_v51 = vmul.f32 %v3543_v7, %v2735_v58  ;;  %v3548_v24 = vld [vmem:[#allocation35_spill] sm:$0xff]  ;;  %v3549_v54 = vld [vmem:[#allocation98_spill] sm:$0xff]  ;;  %v3552_v15 = vld [vmem:[#allocation100_spill] sm:$0xff] }
 0x10c   :  { %v854_v60 = vmul.f32 %v838_v30, %v3542_v4  ;;  %v827_v50 = vmul.f32 0.001, %v3544_v21  ;;  %v841_v43 = vsub.f32 %v825_v44, %v3545_v45  ;;  %v3546_v11 = vsub.f32 %v3444_v10, %v3443_v56  ;;  %v3547_v30 = vld [vmem:[#allocation108_spill] sm:$0xff] }
 0x10d   :  { %v744_v42 = vmul.f32 %v743_v25, %v2707_v33  ;;  %v871_v14 = vmul.f32 0.001, %v703_v32  ;;  %v885_v35 = vsub.f32 %v853_v17, %v869_v13  ;;  %v898_v8 = vadd.f32 %v897_v2, %v883_v61  ;;  %v3551_v61 = vld [vmem:[#allocation36_spill] sm:$0xff]  ;;  %v3557_v2 = vld [vmem:[#allocation114_spill] sm:$0xff] }
 0x10e   :  { %v855_v9 = vmul.f32 %v839_v55, %v3546_v11  ;;  %v707_v22 = vsub.f32 %v2656_v12, %v3547_v30  ;;  %v828_v5 = vmul.f32 0.001, %v3548_v24  ;;  %v842_v59 = vsub.f32 %v826_v26, %v3549_v54  ;;  %v3554_v26 = vld [vmem:[#allocation110_spill] sm:$0xff]  ;;  %v3560_v11 = vld [vmem:[#allocation71_spill] sm:$0xff] }
 0x10f   :  { %v3550_v39 = vsub.f32 %v3446_v1, %v3445_v31  ;;  %v734_v41 = vmul.f32 %v733_v34, %v2707_v33  ;;  %v872_v56 = vmul.f32 0.001, %v704_v57  ;;  %v886_v10 = vsub.f32 %v854_v60, %v870_v19 }
 0x110   :  { %v899_v55 = vadd.f32 %v898_v8, %v884_v37  ;;  %v1132_v23 = vpop.eup %1131  ;;  %v740_v17 = vsub.f32 %v739_v51, %v3464_v28  ;;  %v829_v32 = vmul.f32 0.001, %v3551_v61  ;;  %v843_v12 = vsub.f32 %v827_v50, %v3552_v15  ;;  %v3558_v51 = vld [vmem:[#allocation103_spill] sm:$0xff] }
 0x111   :  { %v856_v44 = vmul.f32 %v840_v48, %v3550_v39  ;;  %v3553_v25 = vsub.f32 %v3448_v49, %v3447_v0  ;;  %v745_v3 = vsub.f32 0.083333336, %v744_v42  ;;  %v873_v16 = vmul.f32 0.001, %v705_v47  ;;  %v3555_v48 = vld [vmem:[#allocation101_spill] sm:$0xff] }
 0x112   :  { %v887_v1 = vsub.f32 %v855_v9, %v871_v14  ;;  %v900_v31 = vadd.f32 %v899_v55, %v885_v35  ;;  %v708_v57 = vsub.f32 %v2659_v36, %v3554_v26  ;;  %v730_v38 = vmul.f32 0.5, %v2684_v53 }
 0x113   :  { %v857_v13 = vmul.f32 %v841_v43, %v3553_v25  ;;  %v844_v4 = vsub.f32 %v828_v5, %v3555_v48  ;;  %v3556_v28 = vsub.f32 %v3450_v63, %v3449_v62  ;;  %v735_v34 = vsub.f32 0.083333336, %v734_v41  ;;  %v1134_v49 = vpop.eup %1133 }
 0x114   :  { %v874_v19 = vmul.f32 0.001, %v706_v29  ;;  %v888_v37 = vsub.f32 %v856_v44, %v872_v56  ;;  %v901_v0 = vadd.f32 %v900_v31, %v886_v10  ;;  %v709_v47 = vsub.f32 %v2662_v6, %v3557_v2  ;;  %v3561_v29 = vld [vmem:[#allocation73_spill] sm:$0xff]  ;;  %v3564_v56 = vld [vmem:[#allocation92_spill] sm:$0xff] }
 0x115   :  { %v858_v60 = vmul.f32 %v842_v59, %v3556_v28  ;;  %v741_v7 = vadd.f32 0.9189385, %v740_v17  ;;  %v845_v21 = vsub.f32 %v829_v32, %v3558_v51  ;;  %v3559_v36 = vsub.f32 %v3481_v20, %v3480_v46 }
 0x116   :  { %v746_v45 = vmul.f32 %v2684_v53, %v745_v3  ;;  %v875_v43 = vmul.f32 0.001, %v707_v22  ;;  %v889_v62 = vsub.f32 %v857_v13, %v873_v16  ;;  %v902_v63 = vadd.f32 %v901_v0, %v887_v1 }
 0x117   :  { %v859_v50 = vmul.f32 %v843_v12, %v3559_v36  ;;  %v720_v9 = vadd.f32 %v3561_v29, %v3560_v11  ;;  %v731_v42 = vsub.f32 %v2735_v58, %v730_v38  ;;  %v3562_v6 = vsub.f32 %v3483_v27, %v3482_v18 }
 0x118   :  { %v916_v35 = vlaneseq  ;;  %v736_v8 = vmul.f32 %v735_v34, %v2707_v33  ;;  %v876_v30 = vmul.f32 0.001, %v708_v57  ;;  %v890_v46 = vsub.f32 %v858_v60, %v874_v19 }
 0x119   :  { %v860_v14 = vmul.f32 %v844_v4, %v3562_v6  ;;  %v903_v20 = vadd.f32 %v902_v63, %v888_v37  ;;  %v724_v24 = vmul.f32 0.6931472, %v1134_v49  ;;  %v3563_v53 = vsub.f32 %v3488_v52, %v3487_v40 }
 0x11a   :  { %v747_v5 = vadd.f32 %v746_v45, %v741_v7  ;;  %v877_v54 = vmul.f32 0.001, %v709_v47  ;;  %v891_v59 = vsub.f32 %v859_v50, %v875_v43  ;;  %v722_v58 = vmul.f32 %v1132_v23, %v720_v9 }
 0x11b   :  { %v861_v22 = vmul.f32 %v845_v21, %v3563_v53  ;;  %v904_v39 = vadd.f32 %v903_v20, %v889_v62  ;;  %v917_v44 = vshrl.u32 %v916_v35, 7  ;;  %v737_v41 = vsub.f32 %v731_v42, %v736_v8 }
 0x11c   :  { %v892_v18 = vsub.f32 %v860_v14, %v876_v30  ;;  %v912_v10 = vsub.f32 16.0, %v3564_v56  ;;  %v749_v33 = vsub.f32 %v747_v5, %v724_v24  ;;  %v919_v61 = vand.u32 127, %v916_v35 }
 0x11d   :  { %v905_v27 = vadd.f32 %v904_v39, %v890_v46  ;;  %v893_v55 = vsub.f32 %v861_v22, %v877_v54  ;;  %v920_v32 = vmul.u32 128, %v917_v44  ;;  %v748_v15 = vsub.f32 %v737_v41, %v722_v58 }
 0x11e   :  { %v913_v40 = vmul.f32 0.001, %v912_v10  ;;  %v910_v25 = vmul.f32 0.001, %v749_v33 }
 0x11f   :  { %v906_v17 = vadd.f32 %v905_v27, %v891_v59  ;;  %v924_v13 = vadd.s32 %v920_v32, %v919_v61 }
 0x120   :  { %v914_v16 = vmul.f32 %v913_v40, %v748_v15 }
 0x121   :  { %v907_v12 = vadd.f32 %v906_v17, %v892_v18  ;;  %vm925_vm0 = vcmp.lt.s32.totalorder %v924_v13, 8 }
 0x123   :  { %v908_v52 = vadd.f32 %v907_v12, %v893_v55 }
 0x125   :  { %v909_v3 = vadd.f32 %v908_v52, %v748_v15 }
 0x127   :  { %v911_v23 = vadd.f32 %v910_v25, %v909_v3 }
 0x129   :  { %v915_v1 = vadd.f32 %v914_v16, %v911_v23 }
 0x12b   :  { %v926_v31 = vsel %vm925_vm0, %v915_v1, 0.0 }
 0x12c   :  { %927 = vst [vmem:[#allocation7] sm:$0xff] %v926_v31 }
 0x12d   :  { %1190 = shalt.err (!%p1187_p6)
}
 0x12e   :  { %s1191_s10 = scalar_lea.hbm %s2809_s2, 128 }
 0x12f   :  { %p1192_p7 = scmp.ne.s32.totalorder %s2809_s2, %s1191_s10  ;;  %p1195_p8 = scmp.lt.u32.totalorder %s1191_s10, %s2809_s2 }
 0x131   :  { %p1197_p9 = pnand %p1195_p8, %p1192_p7 }
 0x133   :  { %1200 = shalt.err (!%p1197_p9)
}
 0x134   :  { %937 = dma.vmem_to_hbm [thread:$0]  %s935_s6, 128, %s2809_s2, [#allocation4]  }
 0x135   :  { %1205 = dma.done.wait [#allocation4], 128  }
 0x136   :  { %1206 = vsyncadd [#allocation4], 4294967168 }
 0x137   :  { %941 = vsyncpa [#allocation3], 1 }
 0x138   :  { %942 = vsyncpa [#allocation6], 1 }
 0x139   :  { %943 = vsyncpa [#allocation4], 1 }

</bundles_post_ra>
